<compile_context>
chip_gen: v7x
topology: tpu7x:2x2x1
jax: 0.10.0
libtpu: 0.0.40
codegen_flags: <defaults>
</compile_context>

<pallas_src>
import jax
import jax.numpy as jnp
from jax.experimental import pallas as pl
from jax.experimental.pallas import tpu as pltpu

LANE = 128
SUBLANE = 8


def _round_up(x, m):
    return ((x + m - 1) // m) * m


def _cdiv(a, b):
    return -(-a // b)


def gaussian_policy_kernel(x_ref, w0_ref, b0_ref, w1_ref, b1_ref, wh_ref, bh_ref, out_ref):
    # fc0 -> relu (cast activation tile to bf16 for the MXU, accumulate in f32)
    x = x_ref[...].astype(jnp.bfloat16)
    h = jnp.dot(x, w0_ref[...], preferred_element_type=jnp.float32) + b0_ref[...]
    h = jnp.maximum(h, 0.0)

    # fc1 -> relu
    h = jnp.dot(h.astype(jnp.bfloat16), w1_ref[...],
                preferred_element_type=jnp.float32) + b1_ref[...]
    h = jnp.maximum(h, 0.0)

    # fused heads: columns [0:half) = mu, [half:2*half) = pre-sigma
    head = jnp.dot(h.astype(jnp.bfloat16), wh_ref[...],
                   preferred_element_type=jnp.float32) + bh_ref[...]

    half = head.shape[-1] // 2
    if half % LANE == 0:
        # Halves are lane-tile aligned: slices are free, exp only on the sigma half.
        out_ref[:, :half] = head[:, :half].astype(out_ref.dtype)
        out_ref[:, half:] = jnp.exp(jnp.clip(head[:, half:], -20.0, 2.0)).astype(out_ref.dtype)
    else:
        # Packed 128-lane head (action_dim <= 64): select inside the single lane tile.
        # (clip bounds exp on the discarded mu lanes, so this is only spare EUP work.)
        col = jax.lax.broadcasted_iota(jnp.int32, head.shape, 1)
        sig = jnp.exp(jnp.clip(head, -20.0, 2.0))
        out_ref[...] = jnp.where(col >= half, sig, head).astype(out_ref.dtype)


def gaussian_policy_forward(state, params, action_dim, *, batch_tile=512, out_dtype=jnp.float32):
    """state: (B, state_dim) f32.  params: packed dict from init_params."""
    B, S = state.shape
    H_pad = params["w1"].shape[0]
    S_pad = params["w0_pad"].shape[0]
    A2 = params["wh"].shape[1]
    A_pack = A2 // 2
    out_size = jnp.dtype(out_dtype).itemsize

    # Batch tiling: keep Bp close to B (no 2x padding waste at awkward sizes) and give
    # the grid >= 2 steps when B allows so ("parallel",) can shard across v7x's 2 TCs.
    n_steps = max(1, _cdiv(B, batch_tile))
    if B >= 2 * SUBLANE:
        n_steps = max(n_steps, 2)
    TB = _round_up(_cdiv(B, n_steps), SUBLANE)
    Bp = TB * n_steps

    def run(x, w0, single_buffer_weights):
        S_in = x.shape[1]
        pipe = {"pipeline_mode": pl.Buffered(1)} if single_buffer_weights else {}

        def resident(shape):
            # constant index_map -> fetched once, stays VMEM-resident across grid steps
            return pl.BlockSpec(shape, lambda i: (0, 0), **pipe)

        in_specs = [
            pl.BlockSpec((TB, S_in), lambda i: (i, 0)),       # x: streamed over batch
            resident((S_in, H_pad)), resident((1, H_pad)),    # w0, b0
            resident((H_pad, H_pad)), resident((1, H_pad)),   # w1, b1
            resident((H_pad, A2)), resident((1, A2)),         # fused mu|sigma head
        ]
        out_specs = pl.BlockSpec((TB, A2), lambda i: (i, 0))

        # Explicit VMEM budget: resident weights + streamed x/out + f32 intermediates.
        wbuf = 1 if single_buffer_weights else 2
        w_bytes = (w0.size + params["w1"].size + params["wh"].size) * 2 * wbuf
        b_bytes = (params["b0"].size + params["b1"].size + params["bh"].size) * 4 * wbuf
        stream_bytes = (TB * S_in * 4 + TB * A2 * out_size) * 2
        interm_bytes = TB * H_pad * (4 * 2 + 2) + TB * A2 * 4
        vmem_limit = int(1.5 * (w_bytes + b_bytes + stream_bytes + interm_bytes)) + (4 << 20)
        vmem_limit = min(vmem_limit, 100 * 1024 * 1024)

        flops = 2 * Bp * (S_in * H_pad + H_pad * H_pad + H_pad * A2)
        bytes_accessed = (Bp * S_in * 4
                          + (w0.size + params["w1"].size + params["wh"].size) * 2
                          + (params["b0"].size + params["b1"].size + params["bh"].size) * 4
                          + Bp * A2 * out_size)
        cost = pl.CostEstimate(flops=int(flops), transcendentals=int(Bp * A_pack),
                               bytes_accessed=int(bytes_accessed))

        return pl.pallas_call(
            gaussian_policy_kernel,
            out_shape=jax.ShapeDtypeStruct((Bp, A2), out_dtype),
            grid_spec=pltpu.PrefetchScalarGridSpec(
                num_scalar_prefetch=0,
                grid=(n_steps,),
                in_specs=in_specs,
                out_specs=out_specs),
            compiler_params=pltpu.CompilerParams(
                dimension_semantics=("parallel",),
                vmem_limit_bytes=vmem_limit),
            cost_estimate=cost,
        )(x, w0, params["b0"], params["w1"], params["b1"], params["wh"], params["bh"])

    # Preferred config: unpadded-lane state stream + single-buffered weights.
    # Fall back to lane-padded x / default buffering if a config does not lower here.
    attempts = ((False, True), (False, False), (True, True), (True, False))
    out, err = None, None
    for pad_lanes, single_buf in attempts:
        try:
            if pad_lanes:
                x_in = jnp.pad(state, ((0, Bp - B), (0, S_pad - S)))
                w0_in = params["w0_pad"]
            else:
                x_in = state if Bp == B else jnp.pad(state, ((0, Bp - B), (0, 0)))
                w0_in = params["w0"]
            out = jax.block_until_ready(run(x_in, w0_in, single_buf))
            break
        except Exception as e:  # lowering / compile failure on this chip -> next config
            err = e
    if out is None:
        raise err

    mu = out[:B, :action_dim].astype(jnp.float32)
    sigma = out[:B, A_pack:A_pack + action_dim].astype(jnp.float32)
    return mu, sigma


def init_params(key, state_dim, action_dim, hidden_dim):
    """Mimics nn.Linear default init + InitializeLinear (weight *= mul, bias = 0),
    then lane-pads / fuses mu+sigma into a single packed head, weights cast to bf16."""
    def linear(k, fan_in, fan_out, mul):
        bound = 1.0 / jnp.sqrt(jnp.float32(fan_in))
        # PyTorch stores (out, in); build (out, in) then transpose to (in, out).
        w = jax.random.uniform(k, (fan_out, fan_in), jnp.float32, -bound, bound) * mul
        b = jnp.zeros((1, fan_out), jnp.float32)
        return w.T, b

    k0, k1, k2, k3 = jax.random.split(key, 4)
    w0, b0 = linear(k0, state_dim, hidden_dim, 1.0)
    w1, b1 = linear(k1, hidden_dim, hidden_dim, 1.0)
    wmu, bmu = linear(k2, hidden_dim, action_dim, 0.1)
    ws, bs = linear(k3, hidden_dim, action_dim, 0.1)
    raw = {"w0": w0, "b0": b0, "w1": w1, "b1": b1,
           "wmu": wmu, "bmu": bmu, "ws": ws, "bs": bs}

    S_pad = _round_up(state_dim, LANE)
    # Note: on v6e/v7x with genuinely large hidden dims, padding H to 256-multiples
    # would better fill the 256-deep MXU; kept at 128-multiples (memory-bound regime).
    H_pad = _round_up(hidden_dim, LANE)
    # Packed head: mu in lanes [0:A_pack), sigma in [A_pack:2*A_pack). For action_dim<=64
    # both heads fit one 128-lane slab; otherwise 2*A_pack is still a multiple of 128.
    A_pack = 64 if action_dim <= 64 else _round_up(action_dim, LANE)
    A2 = 2 * A_pack

    def pad2(a, r, c):
        return jnp.zeros((r, c), a.dtype).at[:a.shape[0], :a.shape[1]].set(a)

    w0p = pad2(w0, state_dim, H_pad).astype(jnp.bfloat16)   # K (state) left unpadded
    w0pp = pad2(w0, S_pad, H_pad).astype(jnp.bfloat16)      # lane-padded fallback copy
    w1p = pad2(w1, H_pad, H_pad).astype(jnp.bfloat16)

    whp = jnp.zeros((H_pad, A2), jnp.float32)
    whp = whp.at[:hidden_dim, :action_dim].set(wmu)
    whp = whp.at[:hidden_dim, A_pack:A_pack + action_dim].set(ws)
    whp = whp.astype(jnp.bfloat16)

    b0p = pad2(b0, 1, H_pad)
    b1p = pad2(b1, 1, H_pad)
    bhp = jnp.zeros((1, A2), jnp.float32)
    bhp = bhp.at[:, :action_dim].set(bmu)
    bhp = bhp.at[:, A_pack:A_pack + action_dim].set(bs)

    packed = {"w0": w0p, "w0_pad": w0pp, "b0": b0p,
              "w1": w1p, "b1": b1p, "wh": whp, "bh": bhp}
    return packed, raw


def reference_forward(state, raw):
    """Pure-JAX reference emulating the kernel's bf16 matmul operands (f32 accumulate)."""
    bf = lambda a: a.astype(jnp.bfloat16).astype(jnp.float32)
    x = bf(state)
    h = jnp.maximum(x @ bf(raw["w0"]) + raw["b0"], 0.0)
    h = jnp.maximum(bf(h) @ bf(raw["w1"]) + raw["b1"], 0.0)
    mu = bf(h) @ bf(raw["wmu"]) + raw["bmu"]
    sigma = jnp.exp(jnp.clip(bf(h) @ bf(raw["ws"]) + raw["bs"], -20.0, 2.0))
    return mu, sigma


if __name__ == "__main__":
    B, STATE_DIM, ACTION_DIM, HIDDEN_DIM = 2, 4, 8, 32

    key = jax.random.PRNGKey(0)
    k_state, k_params = jax.random.split(key)
    state = jax.random.normal(k_state, (B, STATE_DIM), jnp.float32)
    params, raw = init_params(k_params, STATE_DIM, ACTION_DIM, HIDDEN_DIM)

    mu, sigma = gaussian_policy_forward(state, params, ACTION_DIM)
    jax.block_until_ready((mu, sigma))

    mu_ref, sigma_ref = reference_forward(state, raw)
    assert mu.shape == (B, ACTION_DIM) and sigma.shape == (B, ACTION_DIM)
    assert jnp.allclose(mu, mu_ref, atol=1e-4, rtol=1e-4), \
        float(jnp.max(jnp.abs(mu - mu_ref)))
    assert jnp.allclose(sigma, sigma_ref, atol=1e-4, rtol=1e-4), \
        float(jnp.max(jnp.abs(sigma - sigma_ref)))

    print("KERNEL_OK")
</pallas_src>

<mosaic_0001>
module attributes {stable_mosaic.version = 11 : i64} {
  func.func @gaussian_policy_kernel(%arg0: i32, %arg1: memref<8x4xf32, #tpu.memory_space<vmem>>, %arg2: memref<4x128xbf16, #tpu.memory_space<vmem>>, %arg3: memref<1x128xf32, #tpu.memory_space<vmem>>, %arg4: memref<128x128xbf16, #tpu.memory_space<vmem>>, %arg5: memref<1x128xf32, #tpu.memory_space<vmem>>, %arg6: memref<128x128xbf16, #tpu.memory_space<vmem>>, %arg7: memref<1x128xf32, #tpu.memory_space<vmem>>, %arg8: memref<8x128xf32, #tpu.memory_space<vmem>>) attributes {dimension_semantics = [#tpu.dimension_semantics<parallel>], iteration_bounds = array<i64: 1>, scalar_prefetch = 0 : i64, scratch_operands = 0 : i64, tpu.core_type = #tpu.core_type<tc>, window_params = [{transform_indices = @transform_0, window_bounds = array<i64: 8, 4>}, {pipeline_mode = #tpu.pipeline_mode<synchronous>, transform_indices = @transform_1, window_bounds = array<i64: 4, 128>}, {pipeline_mode = #tpu.pipeline_mode<synchronous>, transform_indices = @transform_2, window_bounds = array<i64: 1, 128>}, {pipeline_mode = #tpu.pipeline_mode<synchronous>, transform_indices = @transform_3, window_bounds = array<i64: 128, 128>}, {pipeline_mode = #tpu.pipeline_mode<synchronous>, transform_indices = @transform_4, window_bounds = array<i64: 1, 128>}, {pipeline_mode = #tpu.pipeline_mode<synchronous>, transform_indices = @transform_5, window_bounds = array<i64: 128, 128>}, {pipeline_mode = #tpu.pipeline_mode<synchronous>, transform_indices = @transform_6, window_bounds = array<i64: 1, 128>}, {transform_indices = @transform_7, window_bounds = array<i64: 8, 128>}]} {
    %c0 = arith.constant 0 : index
    %c0_0 = arith.constant 0 : index
    %0 = vector.load %arg1[%c0, %c0_0] : memref<8x4xf32, #tpu.memory_space<vmem>>, vector<8x4xf32>
    %1 = arith.truncf %0 : vector<8x4xf32> to vector<8x4xbf16>
    %c0_1 = arith.constant 0 : index
    %c0_2 = arith.constant 0 : index
    %2 = vector.load %arg2[%c0_1, %c0_2] : memref<4x128xbf16, #tpu.memory_space<vmem>>, vector<4x128xbf16>
    %cst = arith.constant dense<0.000000e+00> : vector<8x128xf32>
    %3 = tpu.matmul %1, %2, %cst {dimension_numbers = #tpu.dot_dimension_numbers<[1], [0], [0], [1], [0, 0, 1, 1], [], []>} : vector<8x4xbf16>, vector<4x128xbf16>, vector<8x128xf32> -> vector<8x128xf32>
    %c0_3 = arith.constant 0 : index
    %c0_4 = arith.constant 0 : index
    %4 = vector.load %arg3[%c0_3, %c0_4] : memref<1x128xf32, #tpu.memory_space<vmem>>, vector<1x128xf32>
    %5 = vector.broadcast %4 : vector<1x128xf32> to vector<8x128xf32>
    %6 = arith.addf %3, %5 : vector<8x128xf32>
    %cst_5 = arith.constant 0.000000e+00 : f32
    %7 = vector.broadcast %cst_5 : f32 to vector<8x128xf32>
    %8 = arith.maximumf %6, %7 : vector<8x128xf32>
    %9 = arith.truncf %8 : vector<8x128xf32> to vector<8x128xbf16>
    %c0_6 = arith.constant 0 : index
    %c0_7 = arith.constant 0 : index
    %10 = vector.load %arg4[%c0_6, %c0_7] : memref<128x128xbf16, #tpu.memory_space<vmem>>, vector<128x128xbf16>
    %cst_8 = arith.constant dense<0.000000e+00> : vector<8x128xf32>
    %11 = tpu.matmul %9, %10, %cst_8 {dimension_numbers = #tpu.dot_dimension_numbers<[1], [0], [0], [1], [0, 0, 1, 1], [], []>} : vector<8x128xbf16>, vector<128x128xbf16>, vector<8x128xf32> -> vector<8x128xf32>
    %c0_9 = arith.constant 0 : index
    %c0_10 = arith.constant 0 : index
    %12 = vector.load %arg5[%c0_9, %c0_10] : memref<1x128xf32, #tpu.memory_space<vmem>>, vector<1x128xf32>
    %13 = vector.broadcast %12 : vector<1x128xf32> to vector<8x128xf32>
    %14 = arith.addf %11, %13 : vector<8x128xf32>
    %cst_11 = arith.constant 0.000000e+00 : f32
    %15 = vector.broadcast %cst_11 : f32 to vector<8x128xf32>
    %16 = arith.maximumf %14, %15 : vector<8x128xf32>
    %17 = arith.truncf %16 : vector<8x128xf32> to vector<8x128xbf16>
    %c0_12 = arith.constant 0 : index
    %c0_13 = arith.constant 0 : index
    %18 = vector.load %arg6[%c0_12, %c0_13] : memref<128x128xbf16, #tpu.memory_space<vmem>>, vector<128x128xbf16>
    %cst_14 = arith.constant dense<0.000000e+00> : vector<8x128xf32>
    %19 = tpu.matmul %17, %18, %cst_14 {dimension_numbers = #tpu.dot_dimension_numbers<[1], [0], [0], [1], [0, 0, 1, 1], [], []>} : vector<8x128xbf16>, vector<128x128xbf16>, vector<8x128xf32> -> vector<8x128xf32>
    %c0_15 = arith.constant 0 : index
    %c0_16 = arith.constant 0 : index
    %20 = vector.load %arg7[%c0_15, %c0_16] : memref<1x128xf32, #tpu.memory_space<vmem>>, vector<1x128xf32>
    %21 = vector.broadcast %20 : vector<1x128xf32> to vector<8x128xf32>
    %22 = arith.addf %19, %21 : vector<8x128xf32>
    %23 = tpu.iota {dimensions = array<i32: 1>} : vector<8x128xi32>
    %cst_17 = arith.constant -2.000000e+01 : f32
    %cst_18 = arith.constant 2.000000e+00 : f32
    %24 = vector.broadcast %cst_17 : f32 to vector<8x128xf32>
    %25 = arith.maximumf %24, %22 : vector<8x128xf32>
    %26 = vector.broadcast %cst_18 : f32 to vector<8x128xf32>
    %27 = arith.minimumf %26, %25 : vector<8x128xf32>
    %28 = math.exp %27 : vector<8x128xf32>
    %c64_i32 = arith.constant 64 : i32
    %29 = vector.broadcast %c64_i32 : i32 to vector<8x128xi32>
    %30 = arith.cmpi sge, %23, %29 : vector<8x128xi32>
    %31 = arith.select %30, %28, %22 : vector<8x128xi1>, vector<8x128xf32>
    %c0_19 = arith.constant 0 : index
    %c0_20 = arith.constant 0 : index
    %32 = vector.load %arg8[%c0_19, %c0_20] : memref<8x128xf32, #tpu.memory_space<vmem>>, vector<8x128xf32>
    tpu.vector_store %arg8[%c0_19, %c0_20], %31 {strides = array<i32>} : memref<8x128xf32, #tpu.memory_space<vmem>>, vector<8x128xf32>,
    return
  }
  func.func @transform_0(%arg0: i32) -> (i32, i32) {
    %c0_i32 = arith.constant 0 : i32
    %c0_i32_0 = arith.constant 0 : i32
    return %arg0, %c0_i32 : i32, i32
  }
  func.func @transform_1(%arg0: i32) -> (i32, i32) {
    %c0_i32 = arith.constant 0 : i32
    %c0_i32_0 = arith.constant 0 : i32
    %c0_i32_1 = arith.constant 0 : i32
    return %c0_i32, %c0_i32_0 : i32, i32
  }
  func.func @transform_2(%arg0: i32) -> (i32, i32) {
    %c0_i32 = arith.constant 0 : i32
    %c0_i32_0 = arith.constant 0 : i32
    %c0_i32_1 = arith.constant 0 : i32
    return %c0_i32, %c0_i32_0 : i32, i32
  }
  func.func @transform_3(%arg0: i32) -> (i32, i32) {
    %c0_i32 = arith.constant 0 : i32
    %c0_i32_0 = arith.constant 0 : i32
    %c0_i32_1 = arith.constant 0 : i32
    return %c0_i32, %c0_i32_0 : i32, i32
  }
  func.func @transform_4(%arg0: i32) -> (i32, i32) {
    %c0_i32 = arith.constant 0 : i32
    %c0_i32_0 = arith.constant 0 : i32
    %c0_i32_1 = arith.constant 0 : i32
    return %c0_i32, %c0_i32_0 : i32, i32
  }
  func.func @transform_5(%arg0: i32) -> (i32, i32) {
    %c0_i32 = arith.constant 0 : i32
    %c0_i32_0 = arith.constant 0 : i32
    %c0_i32_1 = arith.constant 0 : i32
    return %c0_i32, %c0_i32_0 : i32, i32
  }
  func.func @transform_6(%arg0: i32) -> (i32, i32) {
    %c0_i32 = arith.constant 0 : i32
    %c0_i32_0 = arith.constant 0 : i32
    %c0_i32_1 = arith.constant 0 : i32
    return %c0_i32, %c0_i32_0 : i32, i32
  }
  func.func @transform_7(%arg0: i32) -> (i32, i32) {
    %c0_i32 = arith.constant 0 : i32
    %c0_i32_0 = arith.constant 0 : i32
    return %arg0, %c0_i32 : i32, i32
  }
}

module attributes {stable_mosaic.version = 11 : i64} {
  func.func @gaussian_policy_kernel(%arg0: i32, %arg1: memref<8x4xf32, #tpu.memory_space<vmem>>, %arg2: memref<4x128xbf16, #tpu.memory_space<vmem>>, %arg3: memref<1x128xf32, #tpu.memory_space<vmem>>, %arg4: memref<128x128xbf16, #tpu.memory_space<vmem>>, %arg5: memref<1x128xf32, #tpu.memory_space<vmem>>, %arg6: memref<128x128xbf16, #tpu.memory_space<vmem>>, %arg7: memref<1x128xf32, #tpu.memory_space<vmem>>, %arg8: memref<8x128xf32, #tpu.memory_space<vmem>>) attributes {dimension_semantics = [#tpu.dimension_semantics<parallel>], iteration_bounds = array<i64: 1>, scalar_prefetch = 0 : i64, scratch_operands = 0 : i64, tpu.core_type = #tpu.core_type<tc>, window_params = [{transform_indices = @transform_0, window_bounds = array<i64: 8, 4>}, {pipeline_mode = #tpu.pipeline_mode<synchronous>, transform_indices = @transform_1, window_bounds = array<i64: 4, 128>}, {pipeline_mode = #tpu.pipeline_mode<synchronous>, transform_indices = @transform_2, window_bounds = array<i64: 1, 128>}, {pipeline_mode = #tpu.pipeline_mode<synchronous>, transform_indices = @transform_3, window_bounds = array<i64: 128, 128>}, {pipeline_mode = #tpu.pipeline_mode<synchronous>, transform_indices = @transform_4, window_bounds = array<i64: 1, 128>}, {pipeline_mode = #tpu.pipeline_mode<synchronous>, transform_indices = @transform_5, window_bounds = array<i64: 128, 128>}, {pipeline_mode = #tpu.pipeline_mode<synchronous>, transform_indices = @transform_6, window_bounds = array<i64: 1, 128>}, {transform_indices = @transform_7, window_bounds = array<i64: 8, 128>}]} {
    %c0 = arith.constant 0 : index
    %c0_0 = arith.constant 0 : index
    %0 = vector.load %arg1[%c0, %c0_0] : memref<8x4xf32, #tpu.memory_space<vmem>>, vector<8x4xf32>
    %1 = arith.truncf %0 : vector<8x4xf32> to vector<8x4xbf16>
    %c0_1 = arith.constant 0 : index
    %c0_2 = arith.constant 0 : index
    %2 = vector.load %arg2[%c0_1, %c0_2] : memref<4x128xbf16, #tpu.memory_space<vmem>>, vector<4x128xbf16>
    %cst = arith.constant dense<0.000000e+00> : vector<8x128xf32>
    %3 = tpu.matmul %1, %2, %cst {dimension_numbers = #tpu.dot_dimension_numbers<[1], [0], [0], [1], [0, 0, 1, 1], [], []>} : vector<8x4xbf16>, vector<4x128xbf16>, vector<8x128xf32> -> vector<8x128xf32>
    %c0_3 = arith.constant 0 : index
    %c0_4 = arith.constant 0 : index
    %4 = vector.load %arg3[%c0_3, %c0_4] : memref<1x128xf32, #tpu.memory_space<vmem>>, vector<1x128xf32>
    %5 = vector.broadcast %4 : vector<1x128xf32> to vector<8x128xf32>
    %6 = arith.addf %3, %5 : vector<8x128xf32>
    %cst_5 = arith.constant 0.000000e+00 : f32
    %7 = vector.broadcast %cst_5 : f32 to vector<8x128xf32>
    %8 = arith.maximumf %6, %7 : vector<8x128xf32>
    %9 = arith.truncf %8 : vector<8x128xf32> to vector<8x128xbf16>
    %c0_6 = arith.constant 0 : index
    %c0_7 = arith.constant 0 : index
    %10 = vector.load %arg4[%c0_6, %c0_7] : memref<128x128xbf16, #tpu.memory_space<vmem>>, vector<128x128xbf16>
    %cst_8 = arith.constant dense<0.000000e+00> : vector<8x128xf32>
    %11 = tpu.matmul %9, %10, %cst_8 {dimension_numbers = #tpu.dot_dimension_numbers<[1], [0], [0], [1], [0, 0, 1, 1], [], []>} : vector<8x128xbf16>, vector<128x128xbf16>, vector<8x128xf32> -> vector<8x128xf32>
    %c0_9 = arith.constant 0 : index
    %c0_10 = arith.constant 0 : index
    %12 = vector.load %arg5[%c0_9, %c0_10] : memref<1x128xf32, #tpu.memory_space<vmem>>, vector<1x128xf32>
    %13 = vector.broadcast %12 : vector<1x128xf32> to vector<8x128xf32>
    %14 = arith.addf %11, %13 : vector<8x128xf32>
    %cst_11 = arith.constant 0.000000e+00 : f32
    %15 = vector.broadcast %cst_11 : f32 to vector<8x128xf32>
    %16 = arith.maximumf %14, %15 : vector<8x128xf32>
    %17 = arith.truncf %16 : vector<8x128xf32> to vector<8x128xbf16>
    %c0_12 = arith.constant 0 : index
    %c0_13 = arith.constant 0 : index
    %18 = vector.load %arg6[%c0_12, %c0_13] : memref<128x128xbf16, #tpu.memory_space<vmem>>, vector<128x128xbf16>
    %cst_14 = arith.constant dense<0.000000e+00> : vector<8x128xf32>
    %19 = tpu.matmul %17, %18, %cst_14 {dimension_numbers = #tpu.dot_dimension_numbers<[1], [0], [0], [1], [0, 0, 1, 1], [], []>} : vector<8x128xbf16>, vector<128x128xbf16>, vector<8x128xf32> -> vector<8x128xf32>
    %c0_15 = arith.constant 0 : index
    %c0_16 = arith.constant 0 : index
    %20 = vector.load %arg7[%c0_15, %c0_16] : memref<1x128xf32, #tpu.memory_space<vmem>>, vector<1x128xf32>
    %21 = vector.broadcast %20 : vector<1x128xf32> to vector<8x128xf32>
    %22 = arith.addf %19, %21 : vector<8x128xf32>
    %23 = tpu.iota {dimensions = array<i32: 1>} : vector<8x128xi32>
    %cst_17 = arith.constant -2.000000e+01 : f32
    %cst_18 = arith.constant 2.000000e+00 : f32
    %24 = vector.broadcast %cst_17 : f32 to vector<8x128xf32>
    %25 = arith.maximumf %24, %22 : vector<8x128xf32>
    %26 = vector.broadcast %cst_18 : f32 to vector<8x128xf32>
    %27 = arith.minimumf %26, %25 : vector<8x128xf32>
    %28 = math.exp %27 : vector<8x128xf32>
    %c64_i32 = arith.constant 64 : i32
    %29 = vector.broadcast %c64_i32 : i32 to vector<8x128xi32>
    %30 = arith.cmpi sge, %23, %29 : vector<8x128xi32>
    %31 = arith.select %30, %28, %22 : vector<8x128xi1>, vector<8x128xf32>
    %c0_19 = arith.constant 0 : index
    %c0_20 = arith.constant 0 : index
    %32 = vector.load %arg8[%c0_19, %c0_20] : memref<8x128xf32, #tpu.memory_space<vmem>>, vector<8x128xf32>
    tpu.vector_store %arg8[%c0_19, %c0_20], %31 {strides = array<i32>} : memref<8x128xf32, #tpu.memory_space<vmem>>, vector<8x128xf32>,
    return
  }
  func.func @transform_0(%arg0: i32) -> (i32, i32) {
    %c0_i32 = arith.constant 0 : i32
    %c0_i32_0 = arith.constant 0 : i32
    return %arg0, %c0_i32 : i32, i32
  }
  func.func @transform_1(%arg0: i32) -> (i32, i32) {
    %c0_i32 = arith.constant 0 : i32
    %c0_i32_0 = arith.constant 0 : i32
    %c0_i32_1 = arith.constant 0 : i32
    return %c0_i32, %c0_i32_0 : i32, i32
  }
  func.func @transform_2(%arg0: i32) -> (i32, i32) {
    %c0_i32 = arith.constant 0 : i32
    %c0_i32_0 = arith.constant 0 : i32
    %c0_i32_1 = arith.constant 0 : i32
    return %c0_i32, %c0_i32_0 : i32, i32
  }
  func.func @transform_3(%arg0: i32) -> (i32, i32) {
    %c0_i32 = arith.constant 0 : i32
    %c0_i32_0 = arith.constant 0 : i32
    %c0_i32_1 = arith.constant 0 : i32
    return %c0_i32, %c0_i32_0 : i32, i32
  }
  func.func @transform_4(%arg0: i32) -> (i32, i32) {
    %c0_i32 = arith.constant 0 : i32
    %c0_i32_0 = arith.constant 0 : i32
    %c0_i32_1 = arith.constant 0 : i32
    return %c0_i32, %c0_i32_0 : i32, i32
  }
  func.func @transform_5(%arg0: i32) -> (i32, i32) {
    %c0_i32 = arith.constant 0 : i32
    %c0_i32_0 = arith.constant 0 : i32
    %c0_i32_1 = arith.constant 0 : i32
    return %c0_i32, %c0_i32_0 : i32, i32
  }
  func.func @transform_6(%arg0: i32) -> (i32, i32) {
    %c0_i32 = arith.constant 0 : i32
    %c0_i32_0 = arith.constant 0 : i32
    %c0_i32_1 = arith.constant 0 : i32
    return %c0_i32, %c0_i32_0 : i32, i32
  }
  func.func @transform_7(%arg0: i32) -> (i32, i32) {
    %c0_i32 = arith.constant 0 : i32
    %c0_i32_0 = arith.constant 0 : i32
    return %arg0, %c0_i32 : i32, i32
  }
}

module attributes {stable_mosaic.version = 11 : i64} {
  func.func @gaussian_policy_kernel(%arg0: i32, %arg1: memref<8x128xf32, #tpu.memory_space<vmem>>, %arg2: memref<128x128xbf16, #tpu.memory_space<vmem>>, %arg3: memref<1x128xf32, #tpu.memory_space<vmem>>, %arg4: memref<128x128xbf16, #tpu.memory_space<vmem>>, %arg5: memref<1x128xf32, #tpu.memory_space<vmem>>, %arg6: memref<128x128xbf16, #tpu.memory_space<vmem>>, %arg7: memref<1x128xf32, #tpu.memory_space<vmem>>, %arg8: memref<8x128xf32, #tpu.memory_space<vmem>>) attributes {dimension_semantics = [#tpu.dimension_semantics<parallel>], iteration_bounds = array<i64: 1>, scalar_prefetch = 0 : i64, scratch_operands = 0 : i64, tpu.core_type = #tpu.core_type<tc>, window_params = [{transform_indices = @transform_0, window_bounds = array<i64: 8, 128>}, {pipeline_mode = #tpu.pipeline_mode<synchronous>, transform_indices = @transform_1, window_bounds = array<i64: 128, 128>}, {pipeline_mode = #tpu.pipeline_mode<synchronous>, transform_indices = @transform_2, window_bounds = array<i64: 1, 128>}, {pipeline_mode = #tpu.pipeline_mode<synchronous>, transform_indices = @transform_3, window_bounds = array<i64: 128, 128>}, {pipeline_mode = #tpu.pipeline_mode<synchronous>, transform_indices = @transform_4, window_bounds = array<i64: 1, 128>}, {pipeline_mode = #tpu.pipeline_mode<synchronous>, transform_indices = @transform_5, window_bounds = array<i64: 128, 128>}, {pipeline_mode = #tpu.pipeline_mode<synchronous>, transform_indices = @transform_6, window_bounds = array<i64: 1, 128>}, {transform_indices = @transform_7, window_bounds = array<i64: 8, 128>}]} {
    %c0 = arith.constant 0 : index
    %c0_0 = arith.constant 0 : index
    %0 = vector.load %arg1[%c0, %c0_0] : memref<8x128xf32, #tpu.memory_space<vmem>>, vector<8x128xf32>
    %1 = arith.truncf %0 : vector<8x128xf32> to vector<8x128xbf16>
    %c0_1 = arith.constant 0 : index
    %c0_2 = arith.constant 0 : index
    %2 = vector.load %arg2[%c0_1, %c0_2] : memref<128x128xbf16, #tpu.memory_space<vmem>>, vector<128x128xbf16>
    %cst = arith.constant dense<0.000000e+00> : vector<8x128xf32>
    %3 = tpu.matmul %1, %2, %cst {dimension_numbers = #tpu.dot_dimension_numbers<[1], [0], [0], [1], [0, 0, 1, 1], [], []>} : vector<8x128xbf16>, vector<128x128xbf16>, vector<8x128xf32> -> vector<8x128xf32>
    %c0_3 = arith.constant 0 : index
    %c0_4 = arith.constant 0 : index
    %4 = vector.load %arg3[%c0_3, %c0_4] : memref<1x128xf32, #tpu.memory_space<vmem>>, vector<1x128xf32>
    %5 = vector.broadcast %4 : vector<1x128xf32> to vector<8x128xf32>
    %6 = arith.addf %3, %5 : vector<8x128xf32>
    %cst_5 = arith.constant 0.000000e+00 : f32
    %7 = vector.broadcast %cst_5 : f32 to vector<8x128xf32>
    %8 = arith.maximumf %6, %7 : vector<8x128xf32>
    %9 = arith.truncf %8 : vector<8x128xf32> to vector<8x128xbf16>
    %c0_6 = arith.constant 0 : index
    %c0_7 = arith.constant 0 : index
    %10 = vector.load %arg4[%c0_6, %c0_7] : memref<128x128xbf16, #tpu.memory_space<vmem>>, vector<128x128xbf16>
    %cst_8 = arith.constant dense<0.000000e+00> : vector<8x128xf32>
    %11 = tpu.matmul %9, %10, %cst_8 {dimension_numbers = #tpu.dot_dimension_numbers<[1], [0], [0], [1], [0, 0, 1, 1], [], []>} : vector<8x128xbf16>, vector<128x128xbf16>, vector<8x128xf32> -> vector<8x128xf32>
    %c0_9 = arith.constant 0 : index
    %c0_10 = arith.constant 0 : index
    %12 = vector.load %arg5[%c0_9, %c0_10] : memref<1x128xf32, #tpu.memory_space<vmem>>, vector<1x128xf32>
    %13 = vector.broadcast %12 : vector<1x128xf32> to vector<8x128xf32>
    %14 = arith.addf %11, %13 : vector<8x128xf32>
    %cst_11 = arith.constant 0.000000e+00 : f32
    %15 = vector.broadcast %cst_11 : f32 to vector<8x128xf32>
    %16 = arith.maximumf %14, %15 : vector<8x128xf32>
    %17 = arith.truncf %16 : vector<8x128xf32> to vector<8x128xbf16>
    %c0_12 = arith.constant 0 : index
    %c0_13 = arith.constant 0 : index
    %18 = vector.load %arg6[%c0_12, %c0_13] : memref<128x128xbf16, #tpu.memory_space<vmem>>, vector<128x128xbf16>
    %cst_14 = arith.constant dense<0.000000e+00> : vector<8x128xf32>
    %19 = tpu.matmul %17, %18, %cst_14 {dimension_numbers = #tpu.dot_dimension_numbers<[1], [0], [0], [1], [0, 0, 1, 1], [], []>} : vector<8x128xbf16>, vector<128x128xbf16>, vector<8x128xf32> -> vector<8x128xf32>
    %c0_15 = arith.constant 0 : index
    %c0_16 = arith.constant 0 : index
    %20 = vector.load %arg7[%c0_15, %c0_16] : memref<1x128xf32, #tpu.memory_space<vmem>>, vector<1x128xf32>
    %21 = vector.broadcast %20 : vector<1x128xf32> to vector<8x128xf32>
    %22 = arith.addf %19, %21 : vector<8x128xf32>
    %23 = tpu.iota {dimensions = array<i32: 1>} : vector<8x128xi32>
    %cst_17 = arith.constant -2.000000e+01 : f32
    %cst_18 = arith.constant 2.000000e+00 : f32
    %24 = vector.broadcast %cst_17 : f32 to vector<8x128xf32>
    %25 = arith.maximumf %24, %22 : vector<8x128xf32>
    %26 = vector.broadcast %cst_18 : f32 to vector<8x128xf32>
    %27 = arith.minimumf %26, %25 : vector<8x128xf32>
    %28 = math.exp %27 : vector<8x128xf32>
    %c64_i32 = arith.constant 64 : i32
    %29 = vector.broadcast %c64_i32 : i32 to vector<8x128xi32>
    %30 = arith.cmpi sge, %23, %29 : vector<8x128xi32>
    %31 = arith.select %30, %28, %22 : vector<8x128xi1>, vector<8x128xf32>
    %c0_19 = arith.constant 0 : index
    %c0_20 = arith.constant 0 : index
    %32 = vector.load %arg8[%c0_19, %c0_20] : memref<8x128xf32, #tpu.memory_space<vmem>>, vector<8x128xf32>
    tpu.vector_store %arg8[%c0_19, %c0_20], %31 {strides = array<i32>} : memref<8x128xf32, #tpu.memory_space<vmem>>, vector<8x128xf32>,
    return
  }
  func.func @transform_0(%arg0: i32) -> (i32, i32) {
    %c0_i32 = arith.constant 0 : i32
    %c0_i32_0 = arith.constant 0 : i32
    return %arg0, %c0_i32 : i32, i32
  }
  func.func @transform_1(%arg0: i32) -> (i32, i32) {
    %c0_i32 = arith.constant 0 : i32
    %c0_i32_0 = arith.constant 0 : i32
    %c0_i32_1 = arith.constant 0 : i32
    return %c0_i32, %c0_i32_0 : i32, i32
  }
  func.func @transform_2(%arg0: i32) -> (i32, i32) {
    %c0_i32 = arith.constant 0 : i32
    %c0_i32_0 = arith.constant 0 : i32
    %c0_i32_1 = arith.constant 0 : i32
    return %c0_i32, %c0_i32_0 : i32, i32
  }
  func.func @transform_3(%arg0: i32) -> (i32, i32) {
    %c0_i32 = arith.constant 0 : i32
    %c0_i32_0 = arith.constant 0 : i32
    %c0_i32_1 = arith.constant 0 : i32
    return %c0_i32, %c0_i32_0 : i32, i32
  }
  func.func @transform_4(%arg0: i32) -> (i32, i32) {
    %c0_i32 = arith.constant 0 : i32
    %c0_i32_0 = arith.constant 0 : i32
    %c0_i32_1 = arith.constant 0 : i32
    return %c0_i32, %c0_i32_0 : i32, i32
  }
  func.func @transform_5(%arg0: i32) -> (i32, i32) {
    %c0_i32 = arith.constant 0 : i32
    %c0_i32_0 = arith.constant 0 : i32
    %c0_i32_1 = arith.constant 0 : i32
    return %c0_i32, %c0_i32_0 : i32, i32
  }
  func.func @transform_6(%arg0: i32) -> (i32, i32) {
    %c0_i32 = arith.constant 0 : i32
    %c0_i32_0 = arith.constant 0 : i32
    %c0_i32_1 = arith.constant 0 : i32
    return %c0_i32, %c0_i32_0 : i32, i32
  }
  func.func @transform_7(%arg0: i32) -> (i32, i32) {
    %c0_i32 = arith.constant 0 : i32
    %c0_i32_0 = arith.constant 0 : i32
    return %arg0, %c0_i32 : i32, i32
  }
}

module attributes {stable_mosaic.version = 11 : i64} {
  func.func @gaussian_policy_kernel(%arg0: i32, %arg1: memref<8x128xf32, #tpu.memory_space<vmem>>, %arg2: memref<128x128xbf16, #tpu.memory_space<vmem>>, %arg3: memref<1x128xf32, #tpu.memory_space<vmem>>, %arg4: memref<128x128xbf16, #tpu.memory_space<vmem>>, %arg5: memref<1x128xf32, #tpu.memory_space<vmem>>, %arg6: memref<128x128xbf16, #tpu.memory_space<vmem>>, %arg7: memref<1x128xf32, #tpu.memory_space<vmem>>, %arg8: memref<8x128xf32, #tpu.memory_space<vmem>>) attributes {dimension_semantics = [#tpu.dimension_semantics<parallel>], iteration_bounds = array<i64: 1>, scalar_prefetch = 0 : i64, scratch_operands = 0 : i64, tpu.core_type = #tpu.core_type<tc>, window_params = [{transform_indices = @transform_0, window_bounds = array<i64: 8, 128>}, {pipeline_mode = #tpu.pipeline_mode<synchronous>, transform_indices = @transform_1, window_bounds = array<i64: 128, 128>}, {pipeline_mode = #tpu.pipeline_mode<synchronous>, transform_indices = @transform_2, window_bounds = array<i64: 1, 128>}, {pipeline_mode = #tpu.pipeline_mode<synchronous>, transform_indices = @transform_3, window_bounds = array<i64: 128, 128>}, {pipeline_mode = #tpu.pipeline_mode<synchronous>, transform_indices = @transform_4, window_bounds = array<i64: 1, 128>}, {pipeline_mode = #tpu.pipeline_mode<synchronous>, transform_indices = @transform_5, window_bounds = array<i64: 128, 128>}, {pipeline_mode = #tpu.pipeline_mode<synchronous>, transform_indices = @transform_6, window_bounds = array<i64: 1, 128>}, {transform_indices = @transform_7, window_bounds = array<i64: 8, 128>}]} {
    %c0 = arith.constant 0 : index
    %c0_0 = arith.constant 0 : index
    %0 = vector.load %arg1[%c0, %c0_0] : memref<8x128xf32, #tpu.memory_space<vmem>>, vector<8x128xf32>
    %1 = arith.truncf %0 : vector<8x128xf32> to vector<8x128xbf16>
    %c0_1 = arith.constant 0 : index
    %c0_2 = arith.constant 0 : index
    %2 = vector.load %arg2[%c0_1, %c0_2] : memref<128x128xbf16, #tpu.memory_space<vmem>>, vector<128x128xbf16>
    %cst = arith.constant dense<0.000000e+00> : vector<8x128xf32>
    %3 = tpu.matmul %1, %2, %cst {dimension_numbers = #tpu.dot_dimension_numbers<[1], [0], [0], [1], [0, 0, 1, 1], [], []>} : vector<8x128xbf16>, vector<128x128xbf16>, vector<8x128xf32> -> vector<8x128xf32>
    %c0_3 = arith.constant 0 : index
    %c0_4 = arith.constant 0 : index
    %4 = vector.load %arg3[%c0_3, %c0_4] : memref<1x128xf32, #tpu.memory_space<vmem>>, vector<1x128xf32>
    %5 = vector.broadcast %4 : vector<1x128xf32> to vector<8x128xf32>
    %6 = arith.addf %3, %5 : vector<8x128xf32>
    %cst_5 = arith.constant 0.000000e+00 : f32
    %7 = vector.broadcast %cst_5 : f32 to vector<8x128xf32>
    %8 = arith.maximumf %6, %7 : vector<8x128xf32>
    %9 = arith.truncf %8 : vector<8x128xf32> to vector<8x128xbf16>
    %c0_6 = arith.constant 0 : index
    %c0_7 = arith.constant 0 : index
    %10 = vector.load %arg4[%c0_6, %c0_7] : memref<128x128xbf16, #tpu.memory_space<vmem>>, vector<128x128xbf16>
    %cst_8 = arith.constant dense<0.000000e+00> : vector<8x128xf32>
    %11 = tpu.matmul %9, %10, %cst_8 {dimension_numbers = #tpu.dot_dimension_numbers<[1], [0], [0], [1], [0, 0, 1, 1], [], []>} : vector<8x128xbf16>, vector<128x128xbf16>, vector<8x128xf32> -> vector<8x128xf32>
    %c0_9 = arith.constant 0 : index
    %c0_10 = arith.constant 0 : index
    %12 = vector.load %arg5[%c0_9, %c0_10] : memref<1x128xf32, #tpu.memory_space<vmem>>, vector<1x128xf32>
    %13 = vector.broadcast %12 : vector<1x128xf32> to vector<8x128xf32>
    %14 = arith.addf %11, %13 : vector<8x128xf32>
    %cst_11 = arith.constant 0.000000e+00 : f32
    %15 = vector.broadcast %cst_11 : f32 to vector<8x128xf32>
    %16 = arith.maximumf %14, %15 : vector<8x128xf32>
    %17 = arith.truncf %16 : vector<8x128xf32> to vector<8x128xbf16>
    %c0_12 = arith.constant 0 : index
    %c0_13 = arith.constant 0 : index
    %18 = vector.load %arg6[%c0_12, %c0_13] : memref<128x128xbf16, #tpu.memory_space<vmem>>, vector<128x128xbf16>
    %cst_14 = arith.constant dense<0.000000e+00> : vector<8x128xf32>
    %19 = tpu.matmul %17, %18, %cst_14 {dimension_numbers = #tpu.dot_dimension_numbers<[1], [0], [0], [1], [0, 0, 1, 1], [], []>} : vector<8x128xbf16>, vector<128x128xbf16>, vector<8x128xf32> -> vector<8x128xf32>
    %c0_15 = arith.constant 0 : index
    %c0_16 = arith.constant 0 : index
    %20 = vector.load %arg7[%c0_15, %c0_16] : memref<1x128xf32, #tpu.memory_space<vmem>>, vector<1x128xf32>
    %21 = vector.broadcast %20 : vector<1x128xf32> to vector<8x128xf32>
    %22 = arith.addf %19, %21 : vector<8x128xf32>
    %23 = tpu.iota {dimensions = array<i32: 1>} : vector<8x128xi32>
    %cst_17 = arith.constant -2.000000e+01 : f32
    %cst_18 = arith.constant 2.000000e+00 : f32
    %24 = vector.broadcast %cst_17 : f32 to vector<8x128xf32>
    %25 = arith.maximumf %24, %22 : vector<8x128xf32>
    %26 = vector.broadcast %cst_18 : f32 to vector<8x128xf32>
    %27 = arith.minimumf %26, %25 : vector<8x128xf32>
    %28 = math.exp %27 : vector<8x128xf32>
    %c64_i32 = arith.constant 64 : i32
    %29 = vector.broadcast %c64_i32 : i32 to vector<8x128xi32>
    %30 = arith.cmpi sge, %23, %29 : vector<8x128xi32>
    %31 = arith.select %30, %28, %22 : vector<8x128xi1>, vector<8x128xf32>
    %c0_19 = arith.constant 0 : index
    %c0_20 = arith.constant 0 : index
    %32 = vector.load %arg8[%c0_19, %c0_20] : memref<8x128xf32, #tpu.memory_space<vmem>>, vector<8x128xf32>
    tpu.vector_store %arg8[%c0_19, %c0_20], %31 {strides = array<i32>} : memref<8x128xf32, #tpu.memory_space<vmem>>, vector<8x128xf32>,
    return
  }
  func.func @transform_0(%arg0: i32) -> (i32, i32) {
    %c0_i32 = arith.constant 0 : i32
    %c0_i32_0 = arith.constant 0 : i32
    return %arg0, %c0_i32 : i32, i32
  }
  func.func @transform_1(%arg0: i32) -> (i32, i32) {
    %c0_i32 = arith.constant 0 : i32
    %c0_i32_0 = arith.constant 0 : i32
    %c0_i32_1 = arith.constant 0 : i32
    return %c0_i32, %c0_i32_0 : i32, i32
  }
  func.func @transform_2(%arg0: i32) -> (i32, i32) {
    %c0_i32 = arith.constant 0 : i32
    %c0_i32_0 = arith.constant 0 : i32
    %c0_i32_1 = arith.constant 0 : i32
    return %c0_i32, %c0_i32_0 : i32, i32
  }
  func.func @transform_3(%arg0: i32) -> (i32, i32) {
    %c0_i32 = arith.constant 0 : i32
    %c0_i32_0 = arith.constant 0 : i32
    %c0_i32_1 = arith.constant 0 : i32
    return %c0_i32, %c0_i32_0 : i32, i32
  }
  func.func @transform_4(%arg0: i32) -> (i32, i32) {
    %c0_i32 = arith.constant 0 : i32
    %c0_i32_0 = arith.constant 0 : i32
    %c0_i32_1 = arith.constant 0 : i32
    return %c0_i32, %c0_i32_0 : i32, i32
  }
  func.func @transform_5(%arg0: i32) -> (i32, i32) {
    %c0_i32 = arith.constant 0 : i32
    %c0_i32_0 = arith.constant 0 : i32
    %c0_i32_1 = arith.constant 0 : i32
    return %c0_i32, %c0_i32_0 : i32, i32
  }
  func.func @transform_6(%arg0: i32) -> (i32, i32) {
    %c0_i32 = arith.constant 0 : i32
    %c0_i32_0 = arith.constant 0 : i32
    %c0_i32_1 = arith.constant 0 : i32
    return %c0_i32, %c0_i32_0 : i32, i32
  }
  func.func @transform_7(%arg0: i32) -> (i32, i32) {
    %c0_i32 = arith.constant 0 : i32
    %c0_i32_0 = arith.constant 0 : i32
    return %arg0, %c0_i32 : i32, i32
  }
}

</mosaic_0001>

<bundles_post_ra>
// kernel: tpu_custom_call.1
= control target key start
LH: loop header
LB: loop body
LE: loop exit
PB: predicated region body
PF: predicated region fallthrough
CT: control target
= control target key end

     0   :  { %12 = vsyncpa [#allocation3], 0  ;;  %s669_s0 = inlined_call_operand.vmem [shape: f32[8,4], index: 0, kind: input, shape index: {}]   ;;  %s670_s1 = inlined_call_operand.vmem [shape: bf16[4,128], index: 1, kind: input, shape index: {}]   ;;  %s671_s2 = inlined_call_operand.vmem [shape: f32[1,128], index: 2, kind: input, shape index: {}]   ;;  %s672_s3 = inlined_call_operand.hbm [shape: bf16[128,128], index: 3, kind: input, shape index: {}]   ;;  %s673_s4 = inlined_call_operand.vmem [shape: f32[1,128], index: 4, kind: input, shape index: {}]   ;;  %s674_s5 = inlined_call_operand.hbm [shape: bf16[128,128], index: 5, kind: input, shape index: {}]   ;;  %s675_s6 = inlined_call_operand.vmem [shape: f32[1,128], index: 6, kind: input, shape index: {}]   ;;  %s676_s7 = inlined_call_operand.hbm [shape: f32[8,128], index: 7, kind: output, shape index: {}]  }
   0x1   :  { %13 = vsyncpa [#allocation6], 0 }
   0x2   :  { %14 = vsyncpa [#allocation4], 0  ;;  %s548_s24 = smov [#allocation2]   ;;  %s476_s28 = scalar_lea.hbm %s672_s3, 1024 }
   0x3   :  { %s26_s25 = sshll.u32 %s548_s24, 4  ;;  %p477_p0 = scmp.ne.s32.totalorder %s672_s3, %s476_s28  ;;  %s27_s25 = int_to_ptr.vmem [resolvable:$true] %s26_s25 }
   0x4   :  { %p480_p1 = scmp.lt.u32.totalorder %s476_s28, %s672_s3 }
   0x6   :  { %p482_p2 = pnand %p480_p1, %p477_p0 }
   0x8   :  { %485 = shalt.err (!%p482_p2)
}
   0x9   :  { %s486_s10 = scalar_lea.vmem %s27_s25, 1024  ;;  %p491_p4 = scmp.lt.s32.totalorder %s27_s25, %s27_s25 }
   0xa   :  { %p487_p3 = scmp.ne.s32.totalorder %s27_s25, %s486_s10  ;;  %p492_p5 = scmp.lt.s32.totalorder %s486_s10, %s486_s10 }
   0xc   :  { %p493_p6 = por %p492_p5, %p491_p4 }
   0xe   :  { %p494_p7 = pnand %p493_p6, %p487_p3 }
  0x10   :  { %497 = shalt.err (!%p494_p7)
}
  0x11   :  { %s549_s11 = smov 64   ;;  %s550_s12 = smov 4  }
  0x12   :  { %32 = dma.hbm_to_vmem [thread:$0]  %s672_s3, 1024, %s27_s25, [#allocation3], %s549_s11, %s549_s11, %s550_s12  }
  0x13   :  { %s551_s15 = smov [#allocation5]   ;;  %s498_s19 = scalar_lea.hbm %s674_s5, 1024 }
  0x14   :  { %s40_s16 = sshll.u32 %s551_s15, 4  ;;  %p499_p8 = scmp.ne.s32.totalorder %s674_s5, %s498_s19  ;;  %s41_s16 = int_to_ptr.vmem [resolvable:$true] %s40_s16 }
  0x15   :  { %p502_p9 = scmp.lt.u32.totalorder %s498_s19, %s674_s5 }
  0x17   :  { %p504_p10 = pnand %p502_p9, %p499_p8 }
  0x19   :  { %507 = shalt.err (!%p504_p10)
}
  0x1a   :  { %s508_s24 = scalar_lea.vmem %s41_s16, 1024  ;;  %p513_p12 = scmp.lt.s32.totalorder %s41_s16, %s41_s16 }
  0x1b   :  { %p509_p11 = scmp.ne.s32.totalorder %s41_s16, %s508_s24  ;;  %p514_p13 = scmp.lt.s32.totalorder %s508_s24, %s508_s24 }
  0x1d   :  { %p515_p0 = por %p514_p13, %p513_p12 }
  0x1f   :  { %p516_p1 = pnand %p515_p0, %p509_p11 }
  0x21   :  { %519 = shalt.err (!%p516_p1)
}
  0x22   :  { %46 = dma.hbm_to_vmem [thread:$0]  %s674_s5, 1024, %s41_s16, [#allocation6], %s549_s11, %s549_s11, %s550_s12  }
  0x23   :  { %542 = dma.done.wait [#allocation3], 1024  }
  0x24   :  { %543 = vsyncadd [#allocation3], 4294966272 }
  0x25   :  { %544 = dma.done.wait [#allocation6], 1024  }
  0x26   :  { %545 = vsyncadd [#allocation6], 4294966272  ;;  %v552_v0 = vmov 0.0   ;;  %vm553_vm0 = vmmov 0   ;;  %vm70_vm1 = vcmask 1041408   ;;  %v56_v2 = vld [vmem:[%s669_s0] sm:$0xff]  ;;  %v340_v46 = vlaneseq }
  0x27   :  { %405 = vmatprep.subr.bf16.mxu0 %v552_v0  ;;  %407 = vmatprep.mubr.msk.bf16.mxu0 %vm553_vm0, %v552_v0  ;;  %v58_v1 = vld [vmem:[%s670_s1] sm:$0x3]  ;;  %v57_v4 = vpack.c.bf16 %v56_v2, %v56_v2  ;;  %vm66_vm2 = vcmask 31744   ;;  %v459_v6 = vld [vmem:[#allocation2 + $0x8] sm:$0xff]   ;;  %v460_v7 = vld [vmem:[#allocation2 + $0x10] sm:$0xff]  }
  0x28   :  { %411 = vmatprep.subr.bf16.mxu1 %v552_v0  ;;  %427 = vmatprep.mubr.msk.bf16.mxu1 %vm553_vm0, %v552_v0  ;;  %v72_v3 = vsel %vm70_vm1, %v58_v1, 0  ;;  %v458_v5 = vld [vmem:[#allocation2] sm:$0xff]   ;;  %v461_v8 = vld [vmem:[#allocation2 + $0x18] sm:$0xff]   ;;  %v463_v10 = vld [vmem:[#allocation2 + $0x28] sm:$0xff]   ;;  %v341_v47 = vand.u32 127, %v340_v46 }
  0x29   :  { %406 = vmatpush3.bf16.msra.mxu0 %v72_v3  ;;  %412 = vmatpush3.bf16.msra.mxu1 %v458_v5  ;;  %v462_v9 = vld [vmem:[#allocation2 + $0x20] sm:$0xff]   ;;  %v464_v11 = vld [vmem:[#allocation2 + $0x30] sm:$0xff]   ;;  %v465_v12 = vld [vmem:[#allocation2 + $0x38] sm:$0xff]  }
  0x2a   :  { %431 = vmatprep.subr.bf16.mxu0 %v552_v0  ;;  %413 = vmatprep.subr.bf16.mxu1 %v552_v0  ;;  %v466_v13 = vld [vmem:[#allocation5] sm:$0xff]   ;;  %v467_v14 = vld [vmem:[#allocation5 + $0x8] sm:$0xff]   ;;  %v468_v15 = vld [vmem:[#allocation5 + $0x10] sm:$0xff]   ;;  %vm346_vm3 = vcmp.ge.s32.totalorder %v341_v47, 64 }
  0x2b   :  { %v469_v16 = vld [vmem:[#allocation5 + $0x18] sm:$0xff]   ;;  %v470_v17 = vld [vmem:[#allocation5 + $0x20] sm:$0xff]   ;;  %v471_v18 = vld [vmem:[#allocation5 + $0x28] sm:$0xff]  }
  0x2c   :  { %408 = vmatmul.mubr.msk.bf16.vlgmr.msra.gmra.mrb[0].mxu0 %vm66_vm2, %v57_v4  ;;  %v365_v19 = vld [vmem:[%s671_s2] ss:$0 sm:$0xff]  ;;  %v472_v27 = vld [vmem:[#allocation5 + $0x30] sm:$0xff]   ;;  %v473_v28 = vld [vmem:[#allocation5 + $0x38] sm:$0xff]  }
  0x2d   :  { %447 = vmatprep.mubr.msk.bf16.mxu0 %vm553_vm0, %v552_v0  ;;  %414 = vmatpush3.bf16.msra.mxu1 %v459_v6  ;;  %v367_v29 = vld [vmem:[%s673_s4] ss:$0 sm:$0xff]  ;;  %s554_s4 = smov [#allocation7]  }
  0x2e   :  { %415 = vmatprep.subr.bf16.mxu1 %v552_v0  ;;  %432 = vmatpush3.bf16.msra.mxu0 %v466_v13  ;;  %v376_v37 = vld [vmem:[%s675_s6] ss:$0 sm:$0xff]  ;;  %s355_s9 = sshll.u32 %s554_s4, 4  ;;  %s356_s9 = int_to_ptr.vmem [resolvable:$true] %s355_s9 }
  0x2f   :  { %433 = vmatprep.subr.bf16.mxu0 %v552_v0  ;;  %s520_s10 = scalar_lea.vmem %s356_s9, 128  ;;  %p525_p3 = scmp.lt.s32.totalorder %s356_s9, %s356_s9 }
  0x30   :  { %p521_p2 = scmp.ne.s32.totalorder %s356_s9, %s520_s10  ;;  %p526_p4 = scmp.lt.s32.totalorder %s520_s10, %s520_s10 }
  0x31   :  { %416 = vmatpush3.bf16.msra.mxu1 %v460_v7 }
  0x32   :  { %417 = vmatprep.subr.bf16.mxu1 %v552_v0  ;;  %434 = vmatpush3.bf16.msra.mxu0 %v467_v14  ;;  %p527_p5 = por %p526_p4, %p525_p3 }
  0x33   :  { %435 = vmatprep.subr.bf16.mxu0 %v552_v0 }
  0x34   :  { %p528_p6 = pnand %p527_p5, %p521_p2 }
  0x35   :  { %418 = vmatpush3.bf16.msra.mxu1 %v461_v8 }
  0x36   :  { %419 = vmatprep.subr.bf16.mxu1 %v552_v0  ;;  %436 = vmatpush3.bf16.msra.mxu0 %v468_v15 }
  0x37   :  { %437 = vmatprep.subr.bf16.mxu0 %v552_v0 }
  0x39   :  { %420 = vmatpush3.bf16.msra.mxu1 %v462_v9 }
  0x3a   :  { %421 = vmatprep.subr.bf16.mxu1 %v552_v0  ;;  %438 = vmatpush3.bf16.msra.mxu0 %v469_v16 }
  0x3b   :  { %439 = vmatprep.subr.bf16.mxu0 %v552_v0 }
  0x3d   :  { %422 = vmatpush3.bf16.msra.mxu1 %v463_v10 }
  0x3e   :  { %423 = vmatprep.subr.bf16.mxu1 %v552_v0  ;;  %440 = vmatpush3.bf16.msra.mxu0 %v470_v17 }
  0x3f   :  { %441 = vmatprep.subr.bf16.mxu0 %v552_v0 }
  0x41   :  { %424 = vmatpush3.bf16.msra.mxu1 %v464_v11 }
  0x42   :  { %425 = vmatprep.subr.bf16.mxu1 %v552_v0  ;;  %442 = vmatpush3.bf16.msra.mxu0 %v471_v18 }
  0x43   :  { %443 = vmatprep.subr.bf16.mxu0 %v552_v0 }
  0x45   :  { %426 = vmatpush3.bf16.msra.mxu1 %v465_v12 }
  0x46   :  { %444 = vmatpush3.bf16.msra.mxu0 %v472_v27 }
  0x47   :  { %445 = vmatprep.subr.bf16.mxu0 %v552_v0 }
  0x4a   :  { %446 = vmatpush3.bf16.msra.mxu0 %v473_v28 }
  0xff   :  { %v108_v20 = vpop.f32.mrb[0].mxu0 }
 0x100   :  { %v109_v21 = vadd.f32 %v365_v19, %v108_v20  ;;  %v409_v22 = vpop.f32.mrb[1].mxu0 }
 0x101   :  { %v111_v23 = vpop.f32.mrb[2].mxu0 }
 0x102   :  { %v114_v24 = vmax.f32 %v109_v21, 0.0  ;;  %v410_v25 = vpop.f32.mrb[3].mxu0 }
 0x104   :  { %v115_v26 = vpack.c.bf16 %v114_v24, %v114_v24 }
 0x106   :  { %428 = vmatmul.mubr.bf16.vlgmr.msra.gmra.mrb[0].mxu1 %v115_v26 }
 0x1d9   :  { %v221_v30 = vpop.f32.mrb[0].mxu1 }
 0x1da   :  { %v222_v31 = vadd.f32 %v367_v29, %v221_v30  ;;  %v429_v32 = vpop.f32.mrb[1].mxu1 }
 0x1db   :  { %v224_v33 = vpop.f32.mrb[2].mxu1 }
 0x1dc   :  { %v227_v34 = vmax.f32 %v222_v31, 0.0  ;;  %v430_v35 = vpop.f32.mrb[3].mxu1 }
 0x1de   :  { %v228_v36 = vpack.c.bf16 %v227_v34, %v227_v34 }
 0x1e0   :  { %448 = vmatmul.mubr.bf16.vlgmr.msra.gmra.mrb[4].mxu0 %v228_v36 }
 0x2b3   :  { %v334_v38 = vpop.f32.mrb[4].mxu0 }
 0x2b4   :  { %v335_v39 = vadd.f32 %v376_v37, %v334_v38  ;;  %v449_v40 = vpop.f32.mrb[5].mxu0 }
 0x2b5   :  { %v337_v41 = vpop.f32.mrb[6].mxu0 }
 0x2b6   :  { %v342_v42 = vmax.f32 %v335_v39, -20.0  ;;  %v450_v43 = vpop.f32.mrb[7].mxu0 }
 0x2b8   :  { %v343_v44 = vmin.f32 %v342_v42, 2.0 }
 0x2ba   :  { %v344_v45 = vmul.f32 1.442695, %v343_v44 }
 0x2bc   :  { %474 = vpow2.f32 %v344_v45 }
 0x2c6   :  { %v475_v48 = vpop.eup %474 }
 0x2c7   :  { %v347_v49 = vsel %vm346_vm3, %v475_v48, %v335_v39 }
 0x2c8   :  { %348 = vst [vmem:[#allocation7] sm:$0xff] %v347_v49 }
 0x2c9   :  { %531 = shalt.err (!%p528_p6)
}
 0x2ca   :  { %s532_s12 = scalar_lea.hbm %s676_s7, 128 }
 0x2cb   :  { %p533_p7 = scmp.ne.s32.totalorder %s676_s7, %s532_s12  ;;  %p536_p8 = scmp.lt.u32.totalorder %s532_s12, %s676_s7 }
 0x2cd   :  { %p538_p9 = pnand %p536_p8, %p533_p7 }
 0x2cf   :  { %541 = shalt.err (!%p538_p9)
}
 0x2d0   :  { %358 = dma.vmem_to_hbm [thread:$0]  %s356_s9, 128, %s676_s7, [#allocation4]  }
 0x2d1   :  { %546 = dma.done.wait [#allocation4], 128  }
 0x2d2   :  { %547 = vsyncadd [#allocation4], 4294967168 }
 0x2d3   :  { %362 = vsyncpa [#allocation3], 1 }
 0x2d4   :  { %363 = vsyncpa [#allocation6], 1 }
 0x2d5   :  { %364 = vsyncpa [#allocation4], 1 }

// kernel: tpu_custom_call.1
= control target key start
LH: loop header
LB: loop body
LE: loop exit
PB: predicated region body
PF: predicated region fallthrough
CT: control target
= control target key end

     0   :  { %12 = vsyncpa [#allocation3], 0  ;;  %s669_s0 = inlined_call_operand.vmem [shape: f32[8,4], index: 0, kind: input, shape index: {}]   ;;  %s670_s1 = inlined_call_operand.vmem [shape: bf16[4,128], index: 1, kind: input, shape index: {}]   ;;  %s671_s2 = inlined_call_operand.vmem [shape: f32[1,128], index: 2, kind: input, shape index: {}]   ;;  %s672_s3 = inlined_call_operand.hbm [shape: bf16[128,128], index: 3, kind: input, shape index: {}]   ;;  %s673_s4 = inlined_call_operand.vmem [shape: f32[1,128], index: 4, kind: input, shape index: {}]   ;;  %s674_s5 = inlined_call_operand.hbm [shape: bf16[128,128], index: 5, kind: input, shape index: {}]   ;;  %s675_s6 = inlined_call_operand.vmem [shape: f32[1,128], index: 6, kind: input, shape index: {}]   ;;  %s676_s7 = inlined_call_operand.hbm [shape: f32[8,128], index: 7, kind: output, shape index: {}]  }
   0x1   :  { %13 = vsyncpa [#allocation6], 0 }
   0x2   :  { %14 = vsyncpa [#allocation4], 0  ;;  %s548_s24 = smov [#allocation2]   ;;  %s476_s28 = scalar_lea.hbm %s672_s3, 1024 }
   0x3   :  { %s26_s25 = sshll.u32 %s548_s24, 4  ;;  %p477_p0 = scmp.ne.s32.totalorder %s672_s3, %s476_s28  ;;  %s27_s25 = int_to_ptr.vmem [resolvable:$true] %s26_s25 }
   0x4   :  { %p480_p1 = scmp.lt.u32.totalorder %s476_s28, %s672_s3 }
   0x6   :  { %p482_p2 = pnand %p480_p1, %p477_p0 }
   0x8   :  { %485 = shalt.err (!%p482_p2)
}
   0x9   :  { %s486_s10 = scalar_lea.vmem %s27_s25, 1024  ;;  %p491_p4 = scmp.lt.s32.totalorder %s27_s25, %s27_s25 }
   0xa   :  { %p487_p3 = scmp.ne.s32.totalorder %s27_s25, %s486_s10  ;;  %p492_p5 = scmp.lt.s32.totalorder %s486_s10, %s486_s10 }
   0xc   :  { %p493_p6 = por %p492_p5, %p491_p4 }
   0xe   :  { %p494_p7 = pnand %p493_p6, %p487_p3 }
  0x10   :  { %497 = shalt.err (!%p494_p7)
}
  0x11   :  { %s549_s11 = smov 64   ;;  %s550_s12 = smov 4  }
  0x12   :  { %32 = dma.hbm_to_vmem [thread:$0]  %s672_s3, 1024, %s27_s25, [#allocation3], %s549_s11, %s549_s11, %s550_s12  }
  0x13   :  { %s551_s15 = smov [#allocation5]   ;;  %s498_s19 = scalar_lea.hbm %s674_s5, 1024 }
  0x14   :  { %s40_s16 = sshll.u32 %s551_s15, 4  ;;  %p499_p8 = scmp.ne.s32.totalorder %s674_s5, %s498_s19  ;;  %s41_s16 = int_to_ptr.vmem [resolvable:$true] %s40_s16 }
  0x15   :  { %p502_p9 = scmp.lt.u32.totalorder %s498_s19, %s674_s5 }
  0x17   :  { %p504_p10 = pnand %p502_p9, %p499_p8 }
  0x19   :  { %507 = shalt.err (!%p504_p10)
}
  0x1a   :  { %s508_s24 = scalar_lea.vmem %s41_s16, 1024  ;;  %p513_p12 = scmp.lt.s32.totalorder %s41_s16, %s41_s16 }
  0x1b   :  { %p509_p11 = scmp.ne.s32.totalorder %s41_s16, %s508_s24  ;;  %p514_p13 = scmp.lt.s32.totalorder %s508_s24, %s508_s24 }
  0x1d   :  { %p515_p0 = por %p514_p13, %p513_p12 }
  0x1f   :  { %p516_p1 = pnand %p515_p0, %p509_p11 }
  0x21   :  { %519 = shalt.err (!%p516_p1)
}
  0x22   :  { %46 = dma.hbm_to_vmem [thread:$0]  %s674_s5, 1024, %s41_s16, [#allocation6], %s549_s11, %s549_s11, %s550_s12  }
  0x23   :  { %542 = dma.done.wait [#allocation3], 1024  }
  0x24   :  { %543 = vsyncadd [#allocation3], 4294966272 }
  0x25   :  { %544 = dma.done.wait [#allocation6], 1024  }
  0x26   :  { %545 = vsyncadd [#allocation6], 4294966272  ;;  %v552_v0 = vmov 0.0   ;;  %vm553_vm0 = vmmov 0   ;;  %vm70_vm1 = vcmask 1041408   ;;  %v56_v2 = vld [vmem:[%s669_s0] sm:$0xff]  ;;  %v340_v46 = vlaneseq }
  0x27   :  { %405 = vmatprep.subr.bf16.mxu0 %v552_v0  ;;  %407 = vmatprep.mubr.msk.bf16.mxu0 %vm553_vm0, %v552_v0  ;;  %v58_v1 = vld [vmem:[%s670_s1] sm:$0x3]  ;;  %v57_v4 = vpack.c.bf16 %v56_v2, %v56_v2  ;;  %vm66_vm2 = vcmask 31744   ;;  %v459_v6 = vld [vmem:[#allocation2 + $0x8] sm:$0xff]   ;;  %v460_v7 = vld [vmem:[#allocation2 + $0x10] sm:$0xff]  }
  0x28   :  { %411 = vmatprep.subr.bf16.mxu1 %v552_v0  ;;  %427 = vmatprep.mubr.msk.bf16.mxu1 %vm553_vm0, %v552_v0  ;;  %v72_v3 = vsel %vm70_vm1, %v58_v1, 0  ;;  %v458_v5 = vld [vmem:[#allocation2] sm:$0xff]   ;;  %v461_v8 = vld [vmem:[#allocation2 + $0x18] sm:$0xff]   ;;  %v463_v10 = vld [vmem:[#allocation2 + $0x28] sm:$0xff]   ;;  %v341_v47 = vand.u32 127, %v340_v46 }
  0x29   :  { %406 = vmatpush3.bf16.msra.mxu0 %v72_v3  ;;  %412 = vmatpush3.bf16.msra.mxu1 %v458_v5  ;;  %v462_v9 = vld [vmem:[#allocation2 + $0x20] sm:$0xff]   ;;  %v464_v11 = vld [vmem:[#allocation2 + $0x30] sm:$0xff]   ;;  %v465_v12 = vld [vmem:[#allocation2 + $0x38] sm:$0xff]  }
  0x2a   :  { %431 = vmatprep.subr.bf16.mxu0 %v552_v0  ;;  %413 = vmatprep.subr.bf16.mxu1 %v552_v0  ;;  %v466_v13 = vld [vmem:[#allocation5] sm:$0xff]   ;;  %v467_v14 = vld [vmem:[#allocation5 + $0x8] sm:$0xff]   ;;  %v468_v15 = vld [vmem:[#allocation5 + $0x10] sm:$0xff]   ;;  %vm346_vm3 = vcmp.ge.s32.totalorder %v341_v47, 64 }
  0x2b   :  { %v469_v16 = vld [vmem:[#allocation5 + $0x18] sm:$0xff]   ;;  %v470_v17 = vld [vmem:[#allocation5 + $0x20] sm:$0xff]   ;;  %v471_v18 = vld [vmem:[#allocation5 + $0x28] sm:$0xff]  }
  0x2c   :  { %408 = vmatmul.mubr.msk.bf16.vlgmr.msra.gmra.mrb[0].mxu0 %vm66_vm2, %v57_v4  ;;  %v365_v19 = vld [vmem:[%s671_s2] ss:$0 sm:$0xff]  ;;  %v472_v27 = vld [vmem:[#allocation5 + $0x30] sm:$0xff]   ;;  %v473_v28 = vld [vmem:[#allocation5 + $0x38] sm:$0xff]  }
  0x2d   :  { %447 = vmatprep.mubr.msk.bf16.mxu0 %vm553_vm0, %v552_v0  ;;  %414 = vmatpush3.bf16.msra.mxu1 %v459_v6  ;;  %v367_v29 = vld [vmem:[%s673_s4] ss:$0 sm:$0xff]  ;;  %s554_s4 = smov [#allocation7]  }
  0x2e   :  { %415 = vmatprep.subr.bf16.mxu1 %v552_v0  ;;  %432 = vmatpush3.bf16.msra.mxu0 %v466_v13  ;;  %v376_v37 = vld [vmem:[%s675_s6] ss:$0 sm:$0xff]  ;;  %s355_s9 = sshll.u32 %s554_s4, 4  ;;  %s356_s9 = int_to_ptr.vmem [resolvable:$true] %s355_s9 }
  0x2f   :  { %433 = vmatprep.subr.bf16.mxu0 %v552_v0  ;;  %s520_s10 = scalar_lea.vmem %s356_s9, 128  ;;  %p525_p3 = scmp.lt.s32.totalorder %s356_s9, %s356_s9 }
  0x30   :  { %p521_p2 = scmp.ne.s32.totalorder %s356_s9, %s520_s10  ;;  %p526_p4 = scmp.lt.s32.totalorder %s520_s10, %s520_s10 }
  0x31   :  { %416 = vmatpush3.bf16.msra.mxu1 %v460_v7 }
  0x32   :  { %417 = vmatprep.subr.bf16.mxu1 %v552_v0  ;;  %434 = vmatpush3.bf16.msra.mxu0 %v467_v14  ;;  %p527_p5 = por %p526_p4, %p525_p3 }
  0x33   :  { %435 = vmatprep.subr.bf16.mxu0 %v552_v0 }
  0x34   :  { %p528_p6 = pnand %p527_p5, %p521_p2 }
  0x35   :  { %418 = vmatpush3.bf16.msra.mxu1 %v461_v8 }
  0x36   :  { %419 = vmatprep.subr.bf16.mxu1 %v552_v0  ;;  %436 = vmatpush3.bf16.msra.mxu0 %v468_v15 }
  0x37   :  { %437 = vmatprep.subr.bf16.mxu0 %v552_v0 }
  0x39   :  { %420 = vmatpush3.bf16.msra.mxu1 %v462_v9 }
  0x3a   :  { %421 = vmatprep.subr.bf16.mxu1 %v552_v0  ;;  %438 = vmatpush3.bf16.msra.mxu0 %v469_v16 }
  0x3b   :  { %439 = vmatprep.subr.bf16.mxu0 %v552_v0 }
  0x3d   :  { %422 = vmatpush3.bf16.msra.mxu1 %v463_v10 }
  0x3e   :  { %423 = vmatprep.subr.bf16.mxu1 %v552_v0  ;;  %440 = vmatpush3.bf16.msra.mxu0 %v470_v17 }
  0x3f   :  { %441 = vmatprep.subr.bf16.mxu0 %v552_v0 }
  0x41   :  { %424 = vmatpush3.bf16.msra.mxu1 %v464_v11 }
  0x42   :  { %425 = vmatprep.subr.bf16.mxu1 %v552_v0  ;;  %442 = vmatpush3.bf16.msra.mxu0 %v471_v18 }
  0x43   :  { %443 = vmatprep.subr.bf16.mxu0 %v552_v0 }
  0x45   :  { %426 = vmatpush3.bf16.msra.mxu1 %v465_v12 }
  0x46   :  { %444 = vmatpush3.bf16.msra.mxu0 %v472_v27 }
  0x47   :  { %445 = vmatprep.subr.bf16.mxu0 %v552_v0 }
  0x4a   :  { %446 = vmatpush3.bf16.msra.mxu0 %v473_v28 }
  0xff   :  { %v108_v20 = vpop.f32.mrb[0].mxu0 }
 0x100   :  { %v109_v21 = vadd.f32 %v365_v19, %v108_v20  ;;  %v409_v22 = vpop.f32.mrb[1].mxu0 }
 0x101   :  { %v111_v23 = vpop.f32.mrb[2].mxu0 }
 0x102   :  { %v114_v24 = vmax.f32 %v109_v21, 0.0  ;;  %v410_v25 = vpop.f32.mrb[3].mxu0 }
 0x104   :  { %v115_v26 = vpack.c.bf16 %v114_v24, %v114_v24 }
 0x106   :  { %428 = vmatmul.mubr.bf16.vlgmr.msra.gmra.mrb[0].mxu1 %v115_v26 }
 0x1d9   :  { %v221_v30 = vpop.f32.mrb[0].mxu1 }
 0x1da   :  { %v222_v31 = vadd.f32 %v367_v29, %v221_v30  ;;  %v429_v32 = vpop.f32.mrb[1].mxu1 }
 0x1db   :  { %v224_v33 = vpop.f32.mrb[2].mxu1 }
 0x1dc   :  { %v227_v34 = vmax.f32 %v222_v31, 0.0  ;;  %v430_v35 = vpop.f32.mrb[3].mxu1 }
 0x1de   :  { %v228_v36 = vpack.c.bf16 %v227_v34, %v227_v34 }
 0x1e0   :  { %448 = vmatmul.mubr.bf16.vlgmr.msra.gmra.mrb[4].mxu0 %v228_v36 }
 0x2b3   :  { %v334_v38 = vpop.f32.mrb[4].mxu0 }
 0x2b4   :  { %v335_v39 = vadd.f32 %v376_v37, %v334_v38  ;;  %v449_v40 = vpop.f32.mrb[5].mxu0 }
 0x2b5   :  { %v337_v41 = vpop.f32.mrb[6].mxu0 }
 0x2b6   :  { %v342_v42 = vmax.f32 %v335_v39, -20.0  ;;  %v450_v43 = vpop.f32.mrb[7].mxu0 }
 0x2b8   :  { %v343_v44 = vmin.f32 %v342_v42, 2.0 }
 0x2ba   :  { %v344_v45 = vmul.f32 1.442695, %v343_v44 }
 0x2bc   :  { %474 = vpow2.f32 %v344_v45 }
 0x2c6   :  { %v475_v48 = vpop.eup %474 }
 0x2c7   :  { %v347_v49 = vsel %vm346_vm3, %v475_v48, %v335_v39 }
 0x2c8   :  { %348 = vst [vmem:[#allocation7] sm:$0xff] %v347_v49 }
 0x2c9   :  { %531 = shalt.err (!%p528_p6)
}
 0x2ca   :  { %s532_s12 = scalar_lea.hbm %s676_s7, 128 }
 0x2cb   :  { %p533_p7 = scmp.ne.s32.totalorder %s676_s7, %s532_s12  ;;  %p536_p8 = scmp.lt.u32.totalorder %s532_s12, %s676_s7 }
 0x2cd   :  { %p538_p9 = pnand %p536_p8, %p533_p7 }
 0x2cf   :  { %541 = shalt.err (!%p538_p9)
}
 0x2d0   :  { %358 = dma.vmem_to_hbm [thread:$0]  %s356_s9, 128, %s676_s7, [#allocation4]  }
 0x2d1   :  { %546 = dma.done.wait [#allocation4], 128  }
 0x2d2   :  { %547 = vsyncadd [#allocation4], 4294967168 }
 0x2d3   :  { %362 = vsyncpa [#allocation3], 1 }
 0x2d4   :  { %363 = vsyncpa [#allocation6], 1 }
 0x2d5   :  { %364 = vsyncpa [#allocation4], 1 }

// kernel: tpu_custom_call.1
= control target key start
LH: loop header
LB: loop body
LE: loop exit
PB: predicated region body
PF: predicated region fallthrough
CT: control target
= control target key end

     0   :  { %12 = vsyncpa [#allocation3], 0  ;;  %s870_s0 = inlined_call_operand.hbm [shape: f32[8,128], index: 0, kind: input, shape index: {}]   ;;  %s871_s1 = inlined_call_operand.hbm [shape: bf16[128,128], index: 1, kind: input, shape index: {}]   ;;  %s872_s2 = inlined_call_operand.vmem [shape: f32[1,128], index: 2, kind: input, shape index: {}]   ;;  %s873_s3 = inlined_call_operand.hbm [shape: bf16[128,128], index: 3, kind: input, shape index: {}]   ;;  %s874_s4 = inlined_call_operand.vmem [shape: f32[1,128], index: 4, kind: input, shape index: {}]   ;;  %s875_s5 = inlined_call_operand.hbm [shape: bf16[128,128], index: 5, kind: input, shape index: {}]   ;;  %s876_s6 = inlined_call_operand.vmem [shape: f32[1,128], index: 6, kind: input, shape index: {}]   ;;  %s877_s7 = inlined_call_operand.hbm [shape: f32[8,128], index: 7, kind: output, shape index: {}]  }
   0x1   :  { %13 = vsyncpa [#allocation6], 0 }
   0x2   :  { %14 = vsyncpa [#allocation9], 0 }
   0x3   :  { %15 = vsyncpa [#allocation4], 0  ;;  %s713_s24 = smov [#allocation5]   ;;  %s595_s28 = scalar_lea.hbm %s871_s1, 1024 }
   0x4   :  { %s31_s25 = sshll.u32 %s713_s24, 4  ;;  %p596_p0 = scmp.ne.s32.totalorder %s871_s1, %s595_s28  ;;  %s32_s25 = int_to_ptr.vmem [resolvable:$true] %s31_s25 }
   0x5   :  { %p599_p1 = scmp.lt.u32.totalorder %s595_s28, %s871_s1 }
   0x7   :  { %p601_p2 = pnand %p599_p1, %p596_p0 }
   0x9   :  { %604 = shalt.err (!%p601_p2)
}
   0xa   :  { %s605_s10 = scalar_lea.vmem %s32_s25, 1024  ;;  %p610_p4 = scmp.lt.s32.totalorder %s32_s25, %s32_s25 }
   0xb   :  { %p606_p3 = scmp.ne.s32.totalorder %s32_s25, %s605_s10  ;;  %p611_p5 = scmp.lt.s32.totalorder %s605_s10, %s605_s10 }
   0xd   :  { %p612_p6 = por %p611_p5, %p610_p4 }
   0xf   :  { %p613_p7 = pnand %p612_p6, %p606_p3 }
  0x11   :  { %616 = shalt.err (!%p613_p7)
}
  0x12   :  { %s714_s11 = smov 64   ;;  %s715_s12 = smov 4  }
  0x13   :  { %37 = dma.hbm_to_vmem [thread:$0]  %s871_s1, 1024, %s32_s25, [#allocation6], %s714_s11, %s714_s11, %s715_s12  }
  0x14   :  { %s716_s15 = smov [#allocation2]   ;;  %s717_s17 = smov [#allocation7]  }
  0x15   :  { %s22_s16 = sshll.u32 %s716_s15, 4  ;;  %s45_s18 = sshll.u32 %s717_s17, 4  ;;  %s23_s16 = int_to_ptr.vmem [resolvable:$true] %s22_s16  ;;  %s46_s18 = int_to_ptr.vmem [resolvable:$true] %s45_s18 }
  0x16   :  { %s617_s21 = scalar_lea.hbm %s870_s0, 128 }
  0x17   :  { %p618_p8 = scmp.ne.s32.totalorder %s870_s0, %s617_s21  ;;  %p621_p9 = scmp.lt.u32.totalorder %s617_s21, %s870_s0 }
  0x19   :  { %p623_p10 = pnand %p621_p9, %p618_p8 }
  0x1b   :  { %626 = shalt.err (!%p623_p10)
}
  0x1c   :  { %s627_s1 = scalar_lea.vmem %s23_s16, 128  ;;  %p632_p12 = scmp.lt.s32.totalorder %s23_s16, %s23_s16 }
  0x1d   :  { %p628_p11 = scmp.ne.s32.totalorder %s23_s16, %s627_s1  ;;  %p633_p13 = scmp.lt.s32.totalorder %s627_s1, %s627_s1 }
  0x1f   :  { %p634_p0 = por %p633_p13, %p632_p12 }
  0x21   :  { %p635_p1 = pnand %p634_p0, %p628_p11 }
  0x23   :  { %638 = shalt.err (!%p635_p1)
}
  0x24   :  { %25 = dma.hbm_to_vmem [thread:$0]  %s870_s0, 128, %s23_s16, [#allocation3]  }
  0x25   :  { %s639_s30 = scalar_lea.hbm %s873_s3, 1024 }
  0x26   :  { %p640_p2 = scmp.ne.s32.totalorder %s873_s3, %s639_s30  ;;  %p643_p3 = scmp.lt.u32.totalorder %s639_s30, %s873_s3 }
  0x28   :  { %p645_p4 = pnand %p643_p3, %p640_p2 }
  0x2a   :  { %648 = shalt.err (!%p645_p4)
}
  0x2b   :  { %s649_s14 = scalar_lea.vmem %s46_s18, 1024  ;;  %p654_p6 = scmp.lt.s32.totalorder %s46_s18, %s46_s18 }
  0x2c   :  { %p650_p5 = scmp.ne.s32.totalorder %s46_s18, %s649_s14  ;;  %p655_p7 = scmp.lt.s32.totalorder %s649_s14, %s649_s14 }
  0x2e   :  { %p656_p8 = por %p655_p7, %p654_p6 }
  0x30   :  { %p657_p9 = pnand %p656_p8, %p650_p5 }
  0x32   :  { %660 = shalt.err (!%p657_p9)
}
  0x33   :  { %51 = dma.hbm_to_vmem [thread:$0]  %s873_s3, 1024, %s46_s18, [#allocation6], %s714_s11, %s714_s11, %s715_s12  }
  0x34   :  { %s718_s16 = smov [#allocation8]   ;;  %s661_s21 = scalar_lea.hbm %s875_s5, 1024 }
  0x35   :  { %s59_s17 = sshll.u32 %s718_s16, 4  ;;  %p662_p10 = scmp.ne.s32.totalorder %s875_s5, %s661_s21  ;;  %s60_s17 = int_to_ptr.vmem [resolvable:$true] %s59_s17 }
  0x36   :  { %p665_p11 = scmp.lt.u32.totalorder %s661_s21, %s875_s5 }
  0x38   :  { %p667_p12 = pnand %p665_p11, %p662_p10 }
  0x3a   :  { %670 = shalt.err (!%p667_p12)
}
  0x3b   :  { %s671_s1 = scalar_lea.vmem %s60_s17, 1024  ;;  %p676_p0 = scmp.lt.s32.totalorder %s60_s17, %s60_s17 }
  0x3c   :  { %p672_p13 = scmp.ne.s32.totalorder %s60_s17, %s671_s1  ;;  %p677_p1 = scmp.lt.s32.totalorder %s671_s1, %s671_s1 }
  0x3e   :  { %p678_p2 = por %p677_p1, %p676_p0 }
  0x40   :  { %p679_p3 = pnand %p678_p2, %p672_p13 }
  0x42   :  { %682 = shalt.err (!%p679_p3)
}
  0x43   :  { %65 = dma.hbm_to_vmem [thread:$0]  %s875_s5, 1024, %s60_s17, [#allocation9], %s714_s11, %s714_s11, %s715_s12  }
  0x44   :  { %705 = dma.done.wait [#allocation3], 128  }
  0x45   :  { %706 = vsyncadd [#allocation3], 4294967168 }
  0x46   :  { %707 = dma.done.wait [#allocation6], 2048  }
  0x47   :  { %708 = vsyncadd [#allocation6], 4294965248 }
  0x48   :  { %709 = dma.done.wait [#allocation9], 1024  }
  0x49   :  { %710 = vsyncadd [#allocation9], 4294966272  ;;  %v719_v0 = vmov 0.0   ;;  %vm720_vm0 = vmmov 0   ;;  %v569_v1 = vld [vmem:[#allocation5] sm:$0xff]   ;;  %v570_v2 = vld [vmem:[#allocation5 + $0x8] sm:$0xff]   ;;  %v420_v52 = vlaneseq }
  0x4a   :  { %500 = vmatprep.subr.bf16.mxu0 %v719_v0  ;;  %516 = vmatprep.mubr.msk.bf16.mxu0 %vm720_vm0, %v719_v0  ;;  %v571_v3 = vld [vmem:[#allocation5 + $0x10] sm:$0xff]   ;;  %v577_v4 = vld [vmem:[#allocation7] sm:$0xff]   ;;  %v572_v5 = vld [vmem:[#allocation5 + $0x18] sm:$0xff]  }
  0x4b   :  { %520 = vmatprep.subr.bf16.mxu1 %v719_v0  ;;  %536 = vmatprep.mubr.msk.bf16.mxu1 %vm720_vm0, %v719_v0  ;;  %v578_v6 = vld [vmem:[#allocation7 + $0x8] sm:$0xff]   ;;  %v573_v7 = vld [vmem:[#allocation5 + $0x20] sm:$0xff]   ;;  %v579_v8 = vld [vmem:[#allocation7 + $0x10] sm:$0xff]   ;;  %v421_v53 = vand.u32 127, %v420_v52 }
  0x4c   :  { %501 = vmatpush3.bf16.msra.mxu0 %v569_v1  ;;  %521 = vmatpush3.bf16.msra.mxu1 %v577_v4  ;;  %v574_v9 = vld [vmem:[#allocation5 + $0x28] sm:$0xff]   ;;  %v580_v10 = vld [vmem:[#allocation7 + $0x18] sm:$0xff]   ;;  %v575_v11 = vld [vmem:[#allocation5 + $0x30] sm:$0xff]  }
  0x4d   :  { %502 = vmatprep.subr.bf16.mxu0 %v719_v0  ;;  %522 = vmatprep.subr.bf16.mxu1 %v719_v0  ;;  %v581_v12 = vld [vmem:[#allocation7 + $0x20] sm:$0xff]   ;;  %v576_v13 = vld [vmem:[#allocation5 + $0x38] sm:$0xff]   ;;  %v582_v15 = vld [vmem:[#allocation7 + $0x28] sm:$0xff]   ;;  %vm426_vm1 = vcmp.ge.s32.totalorder %v421_v53, 64 }
  0x4e   :  { %v81_v14 = vld [vmem:[#allocation2] sm:$0xff]  ;;  %v583_v17 = vld [vmem:[#allocation7 + $0x30] sm:$0xff]   ;;  %v585_v19 = vld [vmem:[#allocation8] sm:$0xff]  }
  0x4f   :  { %v82_v16 = vpack.c.bf16 %v81_v14, %v81_v14  ;;  %v584_v18 = vld [vmem:[#allocation7 + $0x38] sm:$0xff]   ;;  %v586_v20 = vld [vmem:[#allocation8 + $0x8] sm:$0xff]   ;;  %v587_v21 = vld [vmem:[#allocation8 + $0x10] sm:$0xff]  }
  0x50   :  { %503 = vmatpush3.bf16.msra.mxu0 %v570_v2  ;;  %523 = vmatpush3.bf16.msra.mxu1 %v578_v6  ;;  %v588_v22 = vld [vmem:[#allocation8 + $0x18] sm:$0xff]   ;;  %v589_v23 = vld [vmem:[#allocation8 + $0x20] sm:$0xff]   ;;  %v590_v24 = vld [vmem:[#allocation8 + $0x28] sm:$0xff]  }
  0x51   :  { %504 = vmatprep.subr.bf16.mxu0 %v719_v0  ;;  %524 = vmatprep.subr.bf16.mxu1 %v719_v0  ;;  %v446_v25 = vld [vmem:[%s872_s2] ss:$0 sm:$0xff]  ;;  %v591_v33 = vld [vmem:[#allocation8 + $0x30] sm:$0xff]  }
  0x52   :  { %v592_v34 = vld [vmem:[#allocation8 + $0x38] sm:$0xff]  }
  0x53   :  { %v455_v35 = vld [vmem:[%s874_s4] ss:$0 sm:$0xff]  ;;  %s721_s4 = smov [#allocation10]  }
  0x54   :  { %505 = vmatpush3.bf16.msra.mxu0 %v571_v3  ;;  %525 = vmatpush3.bf16.msra.mxu1 %v579_v8  ;;  %v464_v43 = vld [vmem:[%s876_s6] ss:$0 sm:$0xff]  ;;  %s435_s28 = sshll.u32 %s721_s4, 4  ;;  %s436_s28 = int_to_ptr.vmem [resolvable:$true] %s435_s28 }
  0x55   :  { %506 = vmatprep.subr.bf16.mxu0 %v719_v0  ;;  %526 = vmatprep.subr.bf16.mxu1 %v719_v0  ;;  %s683_s29 = scalar_lea.vmem %s436_s28, 128  ;;  %p688_p5 = scmp.lt.s32.totalorder %s436_s28, %s436_s28 }
  0x56   :  { %p684_p4 = scmp.ne.s32.totalorder %s436_s28, %s683_s29  ;;  %p689_p6 = scmp.lt.s32.totalorder %s683_s29, %s683_s29 }
  0x58   :  { %507 = vmatpush3.bf16.msra.mxu0 %v572_v5  ;;  %527 = vmatpush3.bf16.msra.mxu1 %v580_v10  ;;  %p690_p7 = por %p689_p6, %p688_p5 }
  0x59   :  { %508 = vmatprep.subr.bf16.mxu0 %v719_v0  ;;  %528 = vmatprep.subr.bf16.mxu1 %v719_v0 }
  0x5a   :  { %p691_p8 = pnand %p690_p7, %p684_p4 }
  0x5c   :  { %509 = vmatpush3.bf16.msra.mxu0 %v573_v7  ;;  %529 = vmatpush3.bf16.msra.mxu1 %v581_v12 }
  0x5d   :  { %510 = vmatprep.subr.bf16.mxu0 %v719_v0  ;;  %530 = vmatprep.subr.bf16.mxu1 %v719_v0 }
  0x60   :  { %511 = vmatpush3.bf16.msra.mxu0 %v574_v9  ;;  %531 = vmatpush3.bf16.msra.mxu1 %v582_v15 }
  0x61   :  { %512 = vmatprep.subr.bf16.mxu0 %v719_v0  ;;  %532 = vmatprep.subr.bf16.mxu1 %v719_v0 }
  0x64   :  { %513 = vmatpush3.bf16.msra.mxu0 %v575_v11  ;;  %533 = vmatpush3.bf16.msra.mxu1 %v583_v17 }
  0x65   :  { %514 = vmatprep.subr.bf16.mxu0 %v719_v0  ;;  %534 = vmatprep.subr.bf16.mxu1 %v719_v0 }
  0x68   :  { %515 = vmatpush3.bf16.msra.mxu0 %v576_v13  ;;  %535 = vmatpush3.bf16.msra.mxu1 %v584_v18 }
  0x69   :  { %540 = vmatprep.subr.bf16.mxu0 %v719_v0 }
  0x6b   :  { %517 = vmatmul.mubr.bf16.vlgmr.msra.gmra.mrb[0].mxu0 %v82_v16 }
  0x6c   :  { %556 = vmatprep.mubr.msk.bf16.mxu0 %vm720_vm0, %v719_v0  ;;  %541 = vmatpush3.bf16.msra.mxu0 %v585_v19 }
  0x6d   :  { %542 = vmatprep.subr.bf16.mxu0 %v719_v0 }
  0x70   :  { %543 = vmatpush3.bf16.msra.mxu0 %v586_v20 }
  0x71   :  { %544 = vmatprep.subr.bf16.mxu0 %v719_v0 }
  0x74   :  { %545 = vmatpush3.bf16.msra.mxu0 %v587_v21 }
  0x75   :  { %546 = vmatprep.subr.bf16.mxu0 %v719_v0 }
  0x78   :  { %547 = vmatpush3.bf16.msra.mxu0 %v588_v22 }
  0x79   :  { %548 = vmatprep.subr.bf16.mxu0 %v719_v0 }
  0x7c   :  { %549 = vmatpush3.bf16.msra.mxu0 %v589_v23 }
  0x7d   :  { %550 = vmatprep.subr.bf16.mxu0 %v719_v0 }
  0x80   :  { %551 = vmatpush3.bf16.msra.mxu0 %v590_v24 }
  0x81   :  { %552 = vmatprep.subr.bf16.mxu0 %v719_v0 }
  0x84   :  { %553 = vmatpush3.bf16.msra.mxu0 %v591_v33 }
  0x85   :  { %554 = vmatprep.subr.bf16.mxu0 %v719_v0 }
  0x88   :  { %555 = vmatpush3.bf16.msra.mxu0 %v592_v34 }
 0x13e   :  { %v188_v26 = vpop.f32.mrb[0].mxu0 }
 0x13f   :  { %v189_v27 = vadd.f32 %v446_v25, %v188_v26  ;;  %v518_v28 = vpop.f32.mrb[1].mxu0 }
 0x140   :  { %v191_v29 = vpop.f32.mrb[2].mxu0 }
 0x141   :  { %v194_v30 = vmax.f32 %v189_v27, 0.0  ;;  %v519_v31 = vpop.f32.mrb[3].mxu0 }
 0x143   :  { %v195_v32 = vpack.c.bf16 %v194_v30, %v194_v30 }
 0x145   :  { %537 = vmatmul.mubr.bf16.vlgmr.msra.gmra.mrb[0].mxu1 %v195_v32 }
 0x218   :  { %v301_v36 = vpop.f32.mrb[0].mxu1 }
 0x219   :  { %v302_v37 = vadd.f32 %v455_v35, %v301_v36  ;;  %v538_v38 = vpop.f32.mrb[1].mxu1 }
 0x21a   :  { %v304_v39 = vpop.f32.mrb[2].mxu1 }
 0x21b   :  { %v307_v40 = vmax.f32 %v302_v37, 0.0  ;;  %v539_v41 = vpop.f32.mrb[3].mxu1 }
 0x21d   :  { %v308_v42 = vpack.c.bf16 %v307_v40, %v307_v40 }
 0x21f   :  { %557 = vmatmul.mubr.bf16.vlgmr.msra.gmra.mrb[4].mxu0 %v308_v42 }
 0x2f2   :  { %v414_v44 = vpop.f32.mrb[4].mxu0 }
 0x2f3   :  { %v415_v45 = vadd.f32 %v464_v43, %v414_v44  ;;  %v558_v46 = vpop.f32.mrb[5].mxu0 }
 0x2f4   :  { %v417_v47 = vpop.f32.mrb[6].mxu0 }
 0x2f5   :  { %v422_v48 = vmax.f32 %v415_v45, -20.0  ;;  %v559_v49 = vpop.f32.mrb[7].mxu0 }
 0x2f7   :  { %v423_v50 = vmin.f32 %v422_v48, 2.0 }
 0x2f9   :  { %v424_v51 = vmul.f32 1.442695, %v423_v50 }
 0x2fb   :  { %593 = vpow2.f32 %v424_v51 }
 0x305   :  { %v594_v54 = vpop.eup %593 }
 0x306   :  { %v427_v55 = vsel %vm426_vm1, %v594_v54, %v415_v45 }
 0x307   :  { %428 = vst [vmem:[#allocation10] sm:$0xff] %v427_v55 }
 0x308   :  { %694 = shalt.err (!%p691_p8)
}
 0x309   :  { %s695_s8 = scalar_lea.hbm %s877_s7, 128 }
 0x30a   :  { %p696_p9 = scmp.ne.s32.totalorder %s877_s7, %s695_s8  ;;  %p699_p10 = scmp.lt.u32.totalorder %s695_s8, %s877_s7 }
 0x30c   :  { %p701_p11 = pnand %p699_p10, %p696_p9 }
 0x30e   :  { %704 = shalt.err (!%p701_p11)
}
 0x30f   :  { %438 = dma.vmem_to_hbm [thread:$0]  %s436_s28, 128, %s877_s7, [#allocation4]  }
 0x310   :  { %711 = dma.done.wait [#allocation4], 128  }
 0x311   :  { %712 = vsyncadd [#allocation4], 4294967168 }
 0x312   :  { %442 = vsyncpa [#allocation3], 1 }
 0x313   :  { %443 = vsyncpa [#allocation6], 1 }
 0x314   :  { %444 = vsyncpa [#allocation9], 1 }
 0x315   :  { %445 = vsyncpa [#allocation4], 1 }

// kernel: tpu_custom_call.1
= control target key start
LH: loop header
LB: loop body
LE: loop exit
PB: predicated region body
PF: predicated region fallthrough
CT: control target
= control target key end

     0   :  { %12 = vsyncpa [#allocation3], 0  ;;  %s870_s0 = inlined_call_operand.hbm [shape: f32[8,128], index: 0, kind: input, shape index: {}]   ;;  %s871_s1 = inlined_call_operand.hbm [shape: bf16[128,128], index: 1, kind: input, shape index: {}]   ;;  %s872_s2 = inlined_call_operand.vmem [shape: f32[1,128], index: 2, kind: input, shape index: {}]   ;;  %s873_s3 = inlined_call_operand.hbm [shape: bf16[128,128], index: 3, kind: input, shape index: {}]   ;;  %s874_s4 = inlined_call_operand.vmem [shape: f32[1,128], index: 4, kind: input, shape index: {}]   ;;  %s875_s5 = inlined_call_operand.hbm [shape: bf16[128,128], index: 5, kind: input, shape index: {}]   ;;  %s876_s6 = inlined_call_operand.vmem [shape: f32[1,128], index: 6, kind: input, shape index: {}]   ;;  %s877_s7 = inlined_call_operand.hbm [shape: f32[8,128], index: 7, kind: output, shape index: {}]  }
   0x1   :  { %13 = vsyncpa [#allocation6], 0 }
   0x2   :  { %14 = vsyncpa [#allocation9], 0 }
   0x3   :  { %15 = vsyncpa [#allocation4], 0  ;;  %s713_s24 = smov [#allocation5]   ;;  %s595_s28 = scalar_lea.hbm %s871_s1, 1024 }
   0x4   :  { %s31_s25 = sshll.u32 %s713_s24, 4  ;;  %p596_p0 = scmp.ne.s32.totalorder %s871_s1, %s595_s28  ;;  %s32_s25 = int_to_ptr.vmem [resolvable:$true] %s31_s25 }
   0x5   :  { %p599_p1 = scmp.lt.u32.totalorder %s595_s28, %s871_s1 }
   0x7   :  { %p601_p2 = pnand %p599_p1, %p596_p0 }
   0x9   :  { %604 = shalt.err (!%p601_p2)
}
   0xa   :  { %s605_s10 = scalar_lea.vmem %s32_s25, 1024  ;;  %p610_p4 = scmp.lt.s32.totalorder %s32_s25, %s32_s25 }
   0xb   :  { %p606_p3 = scmp.ne.s32.totalorder %s32_s25, %s605_s10  ;;  %p611_p5 = scmp.lt.s32.totalorder %s605_s10, %s605_s10 }
   0xd   :  { %p612_p6 = por %p611_p5, %p610_p4 }
   0xf   :  { %p613_p7 = pnand %p612_p6, %p606_p3 }
  0x11   :  { %616 = shalt.err (!%p613_p7)
}
  0x12   :  { %s714_s11 = smov 64   ;;  %s715_s12 = smov 4  }
  0x13   :  { %37 = dma.hbm_to_vmem [thread:$0]  %s871_s1, 1024, %s32_s25, [#allocation6], %s714_s11, %s714_s11, %s715_s12  }
  0x14   :  { %s716_s15 = smov [#allocation2]   ;;  %s717_s17 = smov [#allocation7]  }
  0x15   :  { %s22_s16 = sshll.u32 %s716_s15, 4  ;;  %s45_s18 = sshll.u32 %s717_s17, 4  ;;  %s23_s16 = int_to_ptr.vmem [resolvable:$true] %s22_s16  ;;  %s46_s18 = int_to_ptr.vmem [resolvable:$true] %s45_s18 }
  0x16   :  { %s617_s21 = scalar_lea.hbm %s870_s0, 128 }
  0x17   :  { %p618_p8 = scmp.ne.s32.totalorder %s870_s0, %s617_s21  ;;  %p621_p9 = scmp.lt.u32.totalorder %s617_s21, %s870_s0 }
  0x19   :  { %p623_p10 = pnand %p621_p9, %p618_p8 }
  0x1b   :  { %626 = shalt.err (!%p623_p10)
}
  0x1c   :  { %s627_s1 = scalar_lea.vmem %s23_s16, 128  ;;  %p632_p12 = scmp.lt.s32.totalorder %s23_s16, %s23_s16 }
  0x1d   :  { %p628_p11 = scmp.ne.s32.totalorder %s23_s16, %s627_s1  ;;  %p633_p13 = scmp.lt.s32.totalorder %s627_s1, %s627_s1 }
  0x1f   :  { %p634_p0 = por %p633_p13, %p632_p12 }
  0x21   :  { %p635_p1 = pnand %p634_p0, %p628_p11 }
  0x23   :  { %638 = shalt.err (!%p635_p1)
}
  0x24   :  { %25 = dma.hbm_to_vmem [thread:$0]  %s870_s0, 128, %s23_s16, [#allocation3]  }
  0x25   :  { %s639_s30 = scalar_lea.hbm %s873_s3, 1024 }
  0x26   :  { %p640_p2 = scmp.ne.s32.totalorder %s873_s3, %s639_s30  ;;  %p643_p3 = scmp.lt.u32.totalorder %s639_s30, %s873_s3 }
  0x28   :  { %p645_p4 = pnand %p643_p3, %p640_p2 }
  0x2a   :  { %648 = shalt.err (!%p645_p4)
}
  0x2b   :  { %s649_s14 = scalar_lea.vmem %s46_s18, 1024  ;;  %p654_p6 = scmp.lt.s32.totalorder %s46_s18, %s46_s18 }
  0x2c   :  { %p650_p5 = scmp.ne.s32.totalorder %s46_s18, %s649_s14  ;;  %p655_p7 = scmp.lt.s32.totalorder %s649_s14, %s649_s14 }
  0x2e   :  { %p656_p8 = por %p655_p7, %p654_p6 }
  0x30   :  { %p657_p9 = pnand %p656_p8, %p650_p5 }
  0x32   :  { %660 = shalt.err (!%p657_p9)
}
  0x33   :  { %51 = dma.hbm_to_vmem [thread:$0]  %s873_s3, 1024, %s46_s18, [#allocation6], %s714_s11, %s714_s11, %s715_s12  }
  0x34   :  { %s718_s16 = smov [#allocation8]   ;;  %s661_s21 = scalar_lea.hbm %s875_s5, 1024 }
  0x35   :  { %s59_s17 = sshll.u32 %s718_s16, 4  ;;  %p662_p10 = scmp.ne.s32.totalorder %s875_s5, %s661_s21  ;;  %s60_s17 = int_to_ptr.vmem [resolvable:$true] %s59_s17 }
  0x36   :  { %p665_p11 = scmp.lt.u32.totalorder %s661_s21, %s875_s5 }
  0x38   :  { %p667_p12 = pnand %p665_p11, %p662_p10 }
  0x3a   :  { %670 = shalt.err (!%p667_p12)
}
  0x3b   :  { %s671_s1 = scalar_lea.vmem %s60_s17, 1024  ;;  %p676_p0 = scmp.lt.s32.totalorder %s60_s17, %s60_s17 }
  0x3c   :  { %p672_p13 = scmp.ne.s32.totalorder %s60_s17, %s671_s1  ;;  %p677_p1 = scmp.lt.s32.totalorder %s671_s1, %s671_s1 }
  0x3e   :  { %p678_p2 = por %p677_p1, %p676_p0 }
  0x40   :  { %p679_p3 = pnand %p678_p2, %p672_p13 }
  0x42   :  { %682 = shalt.err (!%p679_p3)
}
  0x43   :  { %65 = dma.hbm_to_vmem [thread:$0]  %s875_s5, 1024, %s60_s17, [#allocation9], %s714_s11, %s714_s11, %s715_s12  }
  0x44   :  { %705 = dma.done.wait [#allocation3], 128  }
  0x45   :  { %706 = vsyncadd [#allocation3], 4294967168 }
  0x46   :  { %707 = dma.done.wait [#allocation6], 2048  }
  0x47   :  { %708 = vsyncadd [#allocation6], 4294965248 }
  0x48   :  { %709 = dma.done.wait [#allocation9], 1024  }
  0x49   :  { %710 = vsyncadd [#allocation9], 4294966272  ;;  %v719_v0 = vmov 0.0   ;;  %vm720_vm0 = vmmov 0   ;;  %v569_v1 = vld [vmem:[#allocation5] sm:$0xff]   ;;  %v570_v2 = vld [vmem:[#allocation5 + $0x8] sm:$0xff]   ;;  %v420_v52 = vlaneseq }
  0x4a   :  { %500 = vmatprep.subr.bf16.mxu0 %v719_v0  ;;  %516 = vmatprep.mubr.msk.bf16.mxu0 %vm720_vm0, %v719_v0  ;;  %v571_v3 = vld [vmem:[#allocation5 + $0x10] sm:$0xff]   ;;  %v577_v4 = vld [vmem:[#allocation7] sm:$0xff]   ;;  %v572_v5 = vld [vmem:[#allocation5 + $0x18] sm:$0xff]  }
  0x4b   :  { %520 = vmatprep.subr.bf16.mxu1 %v719_v0  ;;  %536 = vmatprep.mubr.msk.bf16.mxu1 %vm720_vm0, %v719_v0  ;;  %v578_v6 = vld [vmem:[#allocation7 + $0x8] sm:$0xff]   ;;  %v573_v7 = vld [vmem:[#allocation5 + $0x20] sm:$0xff]   ;;  %v579_v8 = vld [vmem:[#allocation7 + $0x10] sm:$0xff]   ;;  %v421_v53 = vand.u32 127, %v420_v52 }
  0x4c   :  { %501 = vmatpush3.bf16.msra.mxu0 %v569_v1  ;;  %521 = vmatpush3.bf16.msra.mxu1 %v577_v4  ;;  %v574_v9 = vld [vmem:[#allocation5 + $0x28] sm:$0xff]   ;;  %v580_v10 = vld [vmem:[#allocation7 + $0x18] sm:$0xff]   ;;  %v575_v11 = vld [vmem:[#allocation5 + $0x30] sm:$0xff]  }
  0x4d   :  { %502 = vmatprep.subr.bf16.mxu0 %v719_v0  ;;  %522 = vmatprep.subr.bf16.mxu1 %v719_v0  ;;  %v581_v12 = vld [vmem:[#allocation7 + $0x20] sm:$0xff]   ;;  %v576_v13 = vld [vmem:[#allocation5 + $0x38] sm:$0xff]   ;;  %v582_v15 = vld [vmem:[#allocation7 + $0x28] sm:$0xff]   ;;  %vm426_vm1 = vcmp.ge.s32.totalorder %v421_v53, 64 }
  0x4e   :  { %v81_v14 = vld [vmem:[#allocation2] sm:$0xff]  ;;  %v583_v17 = vld [vmem:[#allocation7 + $0x30] sm:$0xff]   ;;  %v585_v19 = vld [vmem:[#allocation8] sm:$0xff]  }
  0x4f   :  { %v82_v16 = vpack.c.bf16 %v81_v14, %v81_v14  ;;  %v584_v18 = vld [vmem:[#allocation7 + $0x38] sm:$0xff]   ;;  %v586_v20 = vld [vmem:[#allocation8 + $0x8] sm:$0xff]   ;;  %v587_v21 = vld [vmem:[#allocation8 + $0x10] sm:$0xff]  }
  0x50   :  { %503 = vmatpush3.bf16.msra.mxu0 %v570_v2  ;;  %523 = vmatpush3.bf16.msra.mxu1 %v578_v6  ;;  %v588_v22 = vld [vmem:[#allocation8 + $0x18] sm:$0xff]   ;;  %v589_v23 = vld [vmem:[#allocation8 + $0x20] sm:$0xff]   ;;  %v590_v24 = vld [vmem:[#allocation8 + $0x28] sm:$0xff]  }
  0x51   :  { %504 = vmatprep.subr.bf16.mxu0 %v719_v0  ;;  %524 = vmatprep.subr.bf16.mxu1 %v719_v0  ;;  %v446_v25 = vld [vmem:[%s872_s2] ss:$0 sm:$0xff]  ;;  %v591_v33 = vld [vmem:[#allocation8 + $0x30] sm:$0xff]  }
  0x52   :  { %v592_v34 = vld [vmem:[#allocation8 + $0x38] sm:$0xff]  }
  0x53   :  { %v455_v35 = vld [vmem:[%s874_s4] ss:$0 sm:$0xff]  ;;  %s721_s4 = smov [#allocation10]  }
  0x54   :  { %505 = vmatpush3.bf16.msra.mxu0 %v571_v3  ;;  %525 = vmatpush3.bf16.msra.mxu1 %v579_v8  ;;  %v464_v43 = vld [vmem:[%s876_s6] ss:$0 sm:$0xff]  ;;  %s435_s28 = sshll.u32 %s721_s4, 4  ;;  %s436_s28 = int_to_ptr.vmem [resolvable:$true] %s435_s28 }
  0x55   :  { %506 = vmatprep.subr.bf16.mxu0 %v719_v0  ;;  %526 = vmatprep.subr.bf16.mxu1 %v719_v0  ;;  %s683_s29 = scalar_lea.vmem %s436_s28, 128  ;;  %p688_p5 = scmp.lt.s32.totalorder %s436_s28, %s436_s28 }
  0x56   :  { %p684_p4 = scmp.ne.s32.totalorder %s436_s28, %s683_s29  ;;  %p689_p6 = scmp.lt.s32.totalorder %s683_s29, %s683_s29 }
  0x58   :  { %507 = vmatpush3.bf16.msra.mxu0 %v572_v5  ;;  %527 = vmatpush3.bf16.msra.mxu1 %v580_v10  ;;  %p690_p7 = por %p689_p6, %p688_p5 }
  0x59   :  { %508 = vmatprep.subr.bf16.mxu0 %v719_v0  ;;  %528 = vmatprep.subr.bf16.mxu1 %v719_v0 }
  0x5a   :  { %p691_p8 = pnand %p690_p7, %p684_p4 }
  0x5c   :  { %509 = vmatpush3.bf16.msra.mxu0 %v573_v7  ;;  %529 = vmatpush3.bf16.msra.mxu1 %v581_v12 }
  0x5d   :  { %510 = vmatprep.subr.bf16.mxu0 %v719_v0  ;;  %530 = vmatprep.subr.bf16.mxu1 %v719_v0 }
  0x60   :  { %511 = vmatpush3.bf16.msra.mxu0 %v574_v9  ;;  %531 = vmatpush3.bf16.msra.mxu1 %v582_v15 }
  0x61   :  { %512 = vmatprep.subr.bf16.mxu0 %v719_v0  ;;  %532 = vmatprep.subr.bf16.mxu1 %v719_v0 }
  0x64   :  { %513 = vmatpush3.bf16.msra.mxu0 %v575_v11  ;;  %533 = vmatpush3.bf16.msra.mxu1 %v583_v17 }
  0x65   :  { %514 = vmatprep.subr.bf16.mxu0 %v719_v0  ;;  %534 = vmatprep.subr.bf16.mxu1 %v719_v0 }
  0x68   :  { %515 = vmatpush3.bf16.msra.mxu0 %v576_v13  ;;  %535 = vmatpush3.bf16.msra.mxu1 %v584_v18 }
  0x69   :  { %540 = vmatprep.subr.bf16.mxu0 %v719_v0 }
  0x6b   :  { %517 = vmatmul.mubr.bf16.vlgmr.msra.gmra.mrb[0].mxu0 %v82_v16 }
  0x6c   :  { %556 = vmatprep.mubr.msk.bf16.mxu0 %vm720_vm0, %v719_v0  ;;  %541 = vmatpush3.bf16.msra.mxu0 %v585_v19 }
  0x6d   :  { %542 = vmatprep.subr.bf16.mxu0 %v719_v0 }
  0x70   :  { %543 = vmatpush3.bf16.msra.mxu0 %v586_v20 }
  0x71   :  { %544 = vmatprep.subr.bf16.mxu0 %v719_v0 }
  0x74   :  { %545 = vmatpush3.bf16.msra.mxu0 %v587_v21 }
  0x75   :  { %546 = vmatprep.subr.bf16.mxu0 %v719_v0 }
  0x78   :  { %547 = vmatpush3.bf16.msra.mxu0 %v588_v22 }
  0x79   :  { %548 = vmatprep.subr.bf16.mxu0 %v719_v0 }
  0x7c   :  { %549 = vmatpush3.bf16.msra.mxu0 %v589_v23 }
  0x7d   :  { %550 = vmatprep.subr.bf16.mxu0 %v719_v0 }
  0x80   :  { %551 = vmatpush3.bf16.msra.mxu0 %v590_v24 }
  0x81   :  { %552 = vmatprep.subr.bf16.mxu0 %v719_v0 }
  0x84   :  { %553 = vmatpush3.bf16.msra.mxu0 %v591_v33 }
  0x85   :  { %554 = vmatprep.subr.bf16.mxu0 %v719_v0 }
  0x88   :  { %555 = vmatpush3.bf16.msra.mxu0 %v592_v34 }
 0x13e   :  { %v188_v26 = vpop.f32.mrb[0].mxu0 }
 0x13f   :  { %v189_v27 = vadd.f32 %v446_v25, %v188_v26  ;;  %v518_v28 = vpop.f32.mrb[1].mxu0 }
 0x140   :  { %v191_v29 = vpop.f32.mrb[2].mxu0 }
 0x141   :  { %v194_v30 = vmax.f32 %v189_v27, 0.0  ;;  %v519_v31 = vpop.f32.mrb[3].mxu0 }
 0x143   :  { %v195_v32 = vpack.c.bf16 %v194_v30, %v194_v30 }
 0x145   :  { %537 = vmatmul.mubr.bf16.vlgmr.msra.gmra.mrb[0].mxu1 %v195_v32 }
 0x218   :  { %v301_v36 = vpop.f32.mrb[0].mxu1 }
 0x219   :  { %v302_v37 = vadd.f32 %v455_v35, %v301_v36  ;;  %v538_v38 = vpop.f32.mrb[1].mxu1 }
 0x21a   :  { %v304_v39 = vpop.f32.mrb[2].mxu1 }
 0x21b   :  { %v307_v40 = vmax.f32 %v302_v37, 0.0  ;;  %v539_v41 = vpop.f32.mrb[3].mxu1 }
 0x21d   :  { %v308_v42 = vpack.c.bf16 %v307_v40, %v307_v40 }
 0x21f   :  { %557 = vmatmul.mubr.bf16.vlgmr.msra.gmra.mrb[4].mxu0 %v308_v42 }
 0x2f2   :  { %v414_v44 = vpop.f32.mrb[4].mxu0 }
 0x2f3   :  { %v415_v45 = vadd.f32 %v464_v43, %v414_v44  ;;  %v558_v46 = vpop.f32.mrb[5].mxu0 }
 0x2f4   :  { %v417_v47 = vpop.f32.mrb[6].mxu0 }
 0x2f5   :  { %v422_v48 = vmax.f32 %v415_v45, -20.0  ;;  %v559_v49 = vpop.f32.mrb[7].mxu0 }
 0x2f7   :  { %v423_v50 = vmin.f32 %v422_v48, 2.0 }
 0x2f9   :  { %v424_v51 = vmul.f32 1.442695, %v423_v50 }
 0x2fb   :  { %593 = vpow2.f32 %v424_v51 }
 0x305   :  { %v594_v54 = vpop.eup %593 }
 0x306   :  { %v427_v55 = vsel %vm426_vm1, %v594_v54, %v415_v45 }
 0x307   :  { %428 = vst [vmem:[#allocation10] sm:$0xff] %v427_v55 }
 0x308   :  { %694 = shalt.err (!%p691_p8)
}
 0x309   :  { %s695_s8 = scalar_lea.hbm %s877_s7, 128 }
 0x30a   :  { %p696_p9 = scmp.ne.s32.totalorder %s877_s7, %s695_s8  ;;  %p699_p10 = scmp.lt.u32.totalorder %s695_s8, %s877_s7 }
 0x30c   :  { %p701_p11 = pnand %p699_p10, %p696_p9 }
 0x30e   :  { %704 = shalt.err (!%p701_p11)
}
 0x30f   :  { %438 = dma.vmem_to_hbm [thread:$0]  %s436_s28, 128, %s877_s7, [#allocation4]  }
 0x310   :  { %711 = dma.done.wait [#allocation4], 128  }
 0x311   :  { %712 = vsyncadd [#allocation4], 4294967168 }
 0x312   :  { %442 = vsyncpa [#allocation3], 1 }
 0x313   :  { %443 = vsyncpa [#allocation6], 1 }
 0x314   :  { %444 = vsyncpa [#allocation9], 1 }
 0x315   :  { %445 = vsyncpa [#allocation4], 1 }

</bundles_post_ra>
